<compile_context>
chip_gen: v7x
topology: tpu7x:2x2x1
jax: 0.10.0
libtpu: 0.0.40
codegen_flags: <defaults>
</compile_context>

<pallas_src>
import math

import jax
import jax.numpy as jnp
import numpy as np
from jax.experimental import pallas as pl
from jax.experimental.pallas import tpu as pltpu


# --------------------------------------------------------------------------------------
# Pallas kernel: fused ISAB (MAB0 + MAB1) for a block of TB batch elements per grid step.
# --------------------------------------------------------------------------------------
def _isab_kernel(x_ref, bias_ref, q0h_ref,
                 wkv0_ref, bkv0_ref, wo0_ref, bo0_ref,
                 wq1_ref, bq1_ref, wkv1_ref, bkv1_ref, wo1_ref, bo1_ref,
                 out_ref):
    f32 = jnp.float32
    TB, N, dim_in = x_ref.shape
    H, num_inds, ds = q0h_ref.shape          # hoisted MAB0 queries, already head-split
    dim_V = H * ds
    G = TB * H
    cdt = x_ref.dtype                        # MXU operand dtype (bf16 fast path if inputs are bf16)

    x2d = x_ref[...].reshape(TB * N, dim_in)
    bias = bias_ref[...].astype(f32)         # (TB, 1, N): 0 = valid key, -1e10 = padded key
    bias_g = jnp.broadcast_to(bias[:, None, :, :], (TB, H, 1, N)).reshape(G, 1, N)

    def softmax_lastdim(s):                  # f32 in / f32 out; divide goes to the EUP
        m = jnp.max(s, axis=-1, keepdims=True)
        e = jnp.exp(s - m)
        return e * pl.reciprocal(jnp.sum(e, axis=-1, keepdims=True), approx=True)

    def to_heads_t(x3, L):                   # (TB, L, dim_V) -> (G, ds, L)   [K/V layout]
        return jnp.swapaxes(x3, 1, 2).reshape(G, ds, L)

    def to_heads(x3, L):                     # (TB, L, dim_V) -> (G, L, ds)   [Q layout]
        return jnp.swapaxes(to_heads_t(x3, L), 1, 2)

    def from_heads(g3, L):                   # (G, L, ds) -> (TB*L, dim_V)
        t = jnp.swapaxes(g3, 1, 2).reshape(TB, dim_V, L)
        return jnp.swapaxes(t, 1, 2).reshape(TB * L, dim_V)

    def linear(inp2d, w_ref, b_ref):         # flattened projection, f32 accumulation on the MXU
        return (jnp.dot(inp2d, w_ref[...], preferred_element_type=f32)
                + b_ref[...].astype(f32))

    # ---------------- MAB0: queries = inducing points (hoisted), keys = x, masked ----------
    kv0 = linear(x2d, wkv0_ref, bkv0_ref)                                    # (TB*N, 2*dim_V)
    kv0t = jnp.swapaxes(kv0.astype(cdt).reshape(TB, N, 2 * dim_V), 1, 2)     # (TB, 2*dim_V, N)
    k0t = kv0t[:, :dim_V, :].reshape(G, ds, N)       # K half is pre-scaled by 1/sqrt(dim_V)
    v0t = kv0t[:, dim_V:, :].reshape(G, ds, N)
    q0 = jnp.tile(q0h_ref[...], (TB, 1, 1))                                  # (G, num_inds, ds)
    s0 = jnp.einsum('gqd,gdk->gqk', q0, k0t, preferred_element_type=f32) + bias_g
    a0 = softmax_lastdim(s0)
    o0 = q0.astype(f32) + jnp.einsum('gqk,gdk->gqd', a0.astype(cdt), v0t,
                                     preferred_element_type=f32)
    h0 = from_heads(o0, num_inds)                                            # (TB*num_inds, dim_V)
    h0 = h0 + jnp.maximum(linear(h0.astype(cdt), wo0_ref, bo0_ref), 0.0)     # O + relu(fc_o(O))

    # ---------------- MAB1: queries = x, keys = H (no mask) --------------------------------
    q1f = linear(x2d, wq1_ref, bq1_ref)                                      # (TB*N, dim_V)
    kv1 = linear(h0.astype(cdt), wkv1_ref, bkv1_ref)                         # (TB*num_inds, 2*dim_V)
    kv1t = jnp.swapaxes(kv1.astype(cdt).reshape(TB, num_inds, 2 * dim_V), 1, 2)
    k1t = kv1t[:, :dim_V, :].reshape(G, ds, num_inds)
    v1t = kv1t[:, dim_V:, :].reshape(G, ds, num_inds)
    q1 = to_heads(q1f.reshape(TB, N, dim_V), N)                              # (G, N, ds), f32
    s1 = jnp.einsum('gqd,gdk->gqk', q1.astype(cdt), k1t, preferred_element_type=f32)
    a1 = softmax_lastdim(s1)
    o1 = q1 + jnp.einsum('gqk,gdk->gqd', a1.astype(cdt), v1t, preferred_element_type=f32)
    out = from_heads(o1, N)                                                  # (TB*N, dim_V) slab
    out = out + jnp.maximum(linear(out.astype(cdt), wo1_ref, bo1_ref), 0.0)
    out_ref[...] = out.astype(out_ref.dtype)


# --------------------------------------------------------------------------------------
# Wrapper: Set2SetMod's set_transform (ISAB) on a padded [B, Nmax, dim_in] batch.
# --------------------------------------------------------------------------------------
def set2set_isab_pallas(x_padded, mask, params, *, num_heads, block_b=None):
    B, N, dim_in = x_padded.shape
    I = params["I"]
    num_inds, dim_V = I.shape
    ds = dim_V // num_heads
    HI = jax.lax.Precision.HIGHEST
    scale = 1.0 / math.sqrt(dim_V)

    # ---- host-side one-time parameter transforms --------------------------------------
    # Hoist the batch-invariant MAB0 query projection of the inducing points (head-split).
    q0 = jnp.dot(I, params["wq0"], precision=HI) + params["bq0"]             # (num_inds, dim_V)
    q0_heads = q0.reshape(num_inds, num_heads, ds).transpose(1, 0, 2).astype(x_padded.dtype)
    # Fuse K/V projections; fold 1/sqrt(dim_V) into the K halves.
    wkv0 = jnp.concatenate([params["wk0"] * scale, params["wv0"]], axis=1)
    bkv0 = jnp.concatenate([params["bk0"] * scale, params["bv0"]], axis=1)
    wkv1 = jnp.concatenate([params["wk1"] * scale, params["wv1"]], axis=1)
    bkv1 = jnp.concatenate([params["bk1"] * scale, params["bv1"]], axis=1)

    # ---- pick a batch block and pad B so it divides evenly ----------------------------
    if block_b is None:
        block_b = max(1, min(B, pl.cdiv(256, N)))   # target >=256 rows in flattened projections
    B_pad = pl.cdiv(B, block_b) * block_b
    if B_pad != B:
        x_padded = jnp.pad(x_padded, ((0, B_pad - B), (0, 0), (0, 0)))
        mask = jnp.pad(mask, ((0, B_pad - B), (0, 0)))

    # Mask handling hoisted out of the kernel: additive bias, 0 = keep, -1e10 = padded key.
    attn_bias = jnp.where(mask, 0.0, -1e10).astype(jnp.float32)[:, None, :]  # (B_pad, 1, N)

    weight_args = [q0_heads, wkv0, bkv0, params["wo0"], params["bo0"],
                   params["wq1"], params["bq1"], wkv1, bkv1,
                   params["wo1"], params["bo1"]]

    def full_spec(a):
        return pl.BlockSpec(a.shape, lambda b: (0,) * a.ndim)

    in_specs = [
        pl.BlockSpec((block_b, N, dim_in), lambda b: (b, 0, 0)),   # x block
        pl.BlockSpec((block_b, 1, N), lambda b: (b, 0, 0)),        # attention bias block
    ] + [full_spec(a) for a in weight_args]                        # weights resident in VMEM

    out2d = pl.pallas_call(
        _isab_kernel,
        out_shape=jax.ShapeDtypeStruct((B_pad * N, dim_V), jnp.float32),
        grid_spec=pltpu.PrefetchScalarGridSpec(
            num_scalar_prefetch=0,
            grid=(B_pad // block_b,),
            in_specs=in_specs,
            out_specs=pl.BlockSpec((block_b * N, dim_V), lambda b: (b, 0)),
        ),
        compiler_params=pltpu.CompilerParams(
            dimension_semantics=("parallel",),
            vmem_limit_bytes=48 * 1024 * 1024,      # fits v7x's 64 MiB VMEM, raises v5e's 16 MiB default
        ),
    )(x_padded, attn_bias, *weight_args)

    return out2d[: B * N].reshape(B, N, dim_V)


# --------------------------------------------------------------------------------------
# Pure-JAX reference mirroring the PyTorch MAB / ISAB code exactly.
# --------------------------------------------------------------------------------------
def _mab_reference(Qin, Kin, wq, bq, wk, bk, wv, bv, wo, bo, mask, num_heads):
    HI = jax.lax.Precision.HIGHEST
    dim_V = wq.shape[1]
    Q = jnp.dot(Qin, wq, precision=HI) + bq
    K = jnp.dot(Kin, wk, precision=HI) + bk
    V = jnp.dot(Kin, wv, precision=HI) + bv
    Q_ = jnp.concatenate(jnp.split(Q, num_heads, axis=2), axis=0)
    K_ = jnp.concatenate(jnp.split(K, num_heads, axis=2), axis=0)
    V_ = jnp.concatenate(jnp.split(V, num_heads, axis=2), axis=0)
    scores = jnp.einsum("bqd,bkd->bqk", Q_, K_, precision=HI) / math.sqrt(dim_V)
    if mask is not None:
        mask_rep = jnp.tile(mask[:, None, :], (num_heads, Q.shape[1], 1))
        scores = jnp.where(mask_rep, scores, -1e10)
    A = jax.nn.softmax(scores, axis=2)
    O = Q_ + jnp.einsum("bqk,bkd->bqd", A, V_, precision=HI)
    O = jnp.concatenate(jnp.split(O, num_heads, axis=0), axis=2)
    return O + jax.nn.relu(jnp.dot(O, wo, precision=HI) + bo)


def isab_reference(X, mask, params, *, num_heads):
    B = X.shape[0]
    I_rep = jnp.tile(params["I"][None], (B, 1, 1))
    H = _mab_reference(I_rep, X,
                       params["wq0"], params["bq0"], params["wk0"], params["bk0"],
                       params["wv0"], params["bv0"], params["wo0"], params["bo0"],
                       mask, num_heads)
    return _mab_reference(X, H,
                          params["wq1"], params["bq1"], params["wk1"], params["bk1"],
                          params["wv1"], params["bv1"], params["wo1"], params["bo1"],
                          None, num_heads)


# --------------------------------------------------------------------------------------
# Demo
# --------------------------------------------------------------------------------------
if __name__ == "__main__":
    key = jax.random.PRNGKey(0)
    keys = jax.random.split(key, 12)

    B, Nmax = 4, 8
    dim_in, dim_out, num_heads, num_inds = 16, 32, 4, 8
    node_counts = [5, 7, 3, 8]         # ragged graphs, padded to Nmax

    # Host-side emulation of batch_to_tensor: pad node features and build the mask.
    x_nodes = jax.random.normal(keys[0], (sum(node_counts), dim_in), dtype=jnp.float32)
    stacked_np = np.zeros((B, Nmax, dim_in), np.float32)
    mask_np = np.zeros((B, Nmax), bool)
    off = 0
    for i, cnt in enumerate(node_counts):
        stacked_np[i, :cnt] = np.asarray(x_nodes[off:off + cnt])
        mask_np[i, :cnt] = True
        off += cnt
    stacked = jnp.asarray(stacked_np)
    mask = jnp.asarray(mask_np)

    # Deterministic parameter init (mirrors small-scale torch init).
    def init_linear(k, din, dout):
        kw, kb = jax.random.split(k)
        return (jax.random.normal(kw, (din, dout), jnp.float32) * 0.1,
                jax.random.normal(kb, (1, dout), jnp.float32) * 0.1)

    params = {}
    params["I"] = jax.random.normal(keys[1], (num_inds, dim_out), jnp.float32) * 0.1
    params["wq0"], params["bq0"] = init_linear(keys[2], dim_out, dim_out)   # MAB0: dim_Q=dim_out
    params["wk0"], params["bk0"] = init_linear(keys[3], dim_in, dim_out)
    params["wv0"], params["bv0"] = init_linear(keys[4], dim_in, dim_out)
    params["wo0"], params["bo0"] = init_linear(keys[5], dim_out, dim_out)
    params["wq1"], params["bq1"] = init_linear(keys[6], dim_in, dim_out)    # MAB1: dim_Q=dim_in
    params["wk1"], params["bk1"] = init_linear(keys[7], dim_out, dim_out)
    params["wv1"], params["bv1"] = init_linear(keys[8], dim_out, dim_out)
    params["wo1"], params["bo1"] = init_linear(keys[9], dim_out, dim_out)

    # block_b=2 -> grid=(2,), exercising the batch-blocked path and an even parallel grid.
    out_padded = set2set_isab_pallas(stacked, mask, params, num_heads=num_heads, block_b=2)
    out_padded = jax.block_until_ready(out_padded)

    ref_padded = isab_reference(stacked, mask, params, num_heads=num_heads)
    assert out_padded.shape == (B, Nmax, dim_out)
    assert jnp.allclose(out_padded, ref_padded, atol=2e-3, rtol=2e-3), "mismatch vs reference"

    # Set2SetMod output (dim1_flag=False): gather only the valid (non-padded) rows.
    out = out_padded[mask]
    assert out.shape == (sum(node_counts), dim_out)

    print("KERNEL_OK")
</pallas_src>

<mosaic_0001>
module attributes {stable_mosaic.version = 11 : i64} {
  func.func @_isab_kernel(%arg0: i32, %arg1: memref<2x8x16xf32, #tpu.memory_space<vmem>>, %arg2: memref<2x1x8xf32, #tpu.memory_space<vmem>>, %arg3: memref<4x8x8xf32, #tpu.memory_space<vmem>>, %arg4: memref<16x64xf32, #tpu.memory_space<vmem>>, %arg5: memref<1x64xf32, #tpu.memory_space<vmem>>, %arg6: memref<32x32xf32, #tpu.memory_space<vmem>>, %arg7: memref<1x32xf32, #tpu.memory_space<vmem>>, %arg8: memref<16x32xf32, #tpu.memory_space<vmem>>, %arg9: memref<1x32xf32, #tpu.memory_space<vmem>>, %arg10: memref<32x64xf32, #tpu.memory_space<vmem>>, %arg11: memref<1x64xf32, #tpu.memory_space<vmem>>, %arg12: memref<32x32xf32, #tpu.memory_space<vmem>>, %arg13: memref<1x32xf32, #tpu.memory_space<vmem>>, %arg14: memref<16x32xf32, #tpu.memory_space<vmem>>) attributes {dimension_semantics = [#tpu.dimension_semantics<parallel>], iteration_bounds = array<i64: 2>, scalar_prefetch = 0 : i64, scratch_operands = 0 : i64, tpu.core_type = #tpu.core_type<tc>, window_params = [{transform_indices = @transform_0, window_bounds = array<i64: 2, 8, 16>}, {transform_indices = @transform_1, window_bounds = array<i64: 2, 1, 8>}, {pipeline_mode = #tpu.pipeline_mode<synchronous>, transform_indices = @transform_2, window_bounds = array<i64: 4, 8, 8>}, {pipeline_mode = #tpu.pipeline_mode<synchronous>, transform_indices = @transform_3, window_bounds = array<i64: 16, 64>}, {pipeline_mode = #tpu.pipeline_mode<synchronous>, transform_indices = @transform_4, window_bounds = array<i64: 1, 64>}, {pipeline_mode = #tpu.pipeline_mode<synchronous>, transform_indices = @transform_5, window_bounds = array<i64: 32, 32>}, {pipeline_mode = #tpu.pipeline_mode<synchronous>, transform_indices = @transform_6, window_bounds = array<i64: 1, 32>}, {pipeline_mode = #tpu.pipeline_mode<synchronous>, transform_indices = @transform_7, window_bounds = array<i64: 16, 32>}, {pipeline_mode = #tpu.pipeline_mode<synchronous>, transform_indices = @transform_8, window_bounds = array<i64: 1, 32>}, {pipeline_mode = #tpu.pipeline_mode<synchronous>, transform_indices = @transform_9, window_bounds = array<i64: 32, 64>}, {pipeline_mode = #tpu.pipeline_mode<synchronous>, transform_indices = @transform_10, window_bounds = array<i64: 1, 64>}, {pipeline_mode = #tpu.pipeline_mode<synchronous>, transform_indices = @transform_11, window_bounds = array<i64: 32, 32>}, {pipeline_mode = #tpu.pipeline_mode<synchronous>, transform_indices = @transform_12, window_bounds = array<i64: 1, 32>}, {transform_indices = @transform_13, window_bounds = array<i64: 16, 32>}]} {
    %c0 = arith.constant 0 : index
    %c0_0 = arith.constant 0 : index
    %c0_1 = arith.constant 0 : index
    %0 = vector.load %arg1[%c0, %c0_0, %c0_1] : memref<2x8x16xf32, #tpu.memory_space<vmem>>, vector<2x8x16xf32>
    %1 = vector.shape_cast %0 : vector<2x8x16xf32> to vector<16x16xf32>
    %c0_2 = arith.constant 0 : index
    %c0_3 = arith.constant 0 : index
    %c0_4 = arith.constant 0 : index
    %2 = vector.load %arg2[%c0_2, %c0_3, %c0_4] : memref<2x1x8xf32, #tpu.memory_space<vmem>>, vector<2x1x8xf32>
    %3 = vector.shape_cast %2 : vector<2x1x8xf32> to vector<2x1x1x8xf32>
    %4 = vector.shape_cast %3 : vector<2x1x1x8xf32> to vector<2x1x1x8xf32>
    %5 = vector.broadcast %4 : vector<2x1x1x8xf32> to vector<2x4x1x8xf32>
    %6 = vector.shape_cast %5 : vector<2x4x1x8xf32> to vector<8x1x8xf32>
    %c0_5 = arith.constant 0 : index
    %c0_6 = arith.constant 0 : index
    %7 = vector.load %arg4[%c0_5, %c0_6] : memref<16x64xf32, #tpu.memory_space<vmem>>, vector<16x64xf32>
    %cst = arith.constant dense<0.000000e+00> : vector<16x64xf32>
    %8 = tpu.matmul %1, %7, %cst {dimension_numbers = #tpu.dot_dimension_numbers<[1], [0], [0], [1], [0, 0, 1, 1], [], []>} : vector<16x16xf32>, vector<16x64xf32>, vector<16x64xf32> -> vector<16x64xf32>
    %c0_7 = arith.constant 0 : index
    %c0_8 = arith.constant 0 : index
    %9 = vector.load %arg5[%c0_7, %c0_8] : memref<1x64xf32, #tpu.memory_space<vmem>>, vector<1x64xf32>
    %10 = vector.broadcast %9 : vector<1x64xf32> to vector<16x64xf32>
    %11 = arith.addf %8, %10 : vector<16x64xf32>
    %12 = vector.shape_cast %11 : vector<16x64xf32> to vector<2x8x64xf32>
    %13 = tpu.transpose %12, [0, 2, 1] : vector<2x8x64xf32> -> vector<2x64x8xf32>
    %14 = vector.extract_strided_slice %13 {offsets = [0, 0, 0], sizes = [2, 32, 8], strides = [1, 1, 1]} : vector<2x64x8xf32> to vector<2x32x8xf32>
    %15 = vector.shape_cast %14 : vector<2x32x8xf32> to vector<8x8x8xf32>
    %16 = vector.extract_strided_slice %13 {offsets = [0, 32, 0], sizes = [2, 32, 8], strides = [1, 1, 1]} : vector<2x64x8xf32> to vector<2x32x8xf32>
    %17 = vector.shape_cast %16 : vector<2x32x8xf32> to vector<8x8x8xf32>
    %c0_9 = arith.constant 0 : index
    %c0_10 = arith.constant 0 : index
    %c0_11 = arith.constant 0 : index
    %18 = vector.load %arg3[%c0_9, %c0_10, %c0_11] : memref<4x8x8xf32, #tpu.memory_space<vmem>>, vector<4x8x8xf32>
    %19 = tpu.concatenate %18, %18 in 0 : vector<4x8x8xf32>, vector<4x8x8xf32> -> vector<8x8x8xf32>
    "tpu.trace_start"() <{level = 10 : i32, message = "gqd,gdk->gqk"}> : () -> ()
    %cst_12 = arith.constant dense<0.000000e+00> : vector<8x8x8xf32>
    %20 = tpu.matmul %19, %15, %cst_12 {dimension_numbers = #tpu.dot_dimension_numbers<[2], [1], [1], [2], [0, 0, 0, 1, 1, 2], [0], [0]>} : vector<8x8x8xf32>, vector<8x8x8xf32>, vector<8x8x8xf32> -> vector<8x8x8xf32>
    "tpu.trace_stop"() : () -> ()
    %21 = vector.broadcast %6 : vector<8x1x8xf32> to vector<8x8x8xf32>
    %22 = arith.addf %20, %21 : vector<8x8x8xf32>
    %cst_13 = arith.constant dense<0xFF800000> : vector<8x8xf32>
    %23 = vector.multi_reduction <maximumf>, %22, %cst_13 [2] : vector<8x8x8xf32> to vector<8x8xf32>
    %24 = vector.shape_cast %23 : vector<8x8xf32> to vector<8x8x1xf32>
    %25 = vector.broadcast %24 : vector<8x8x1xf32> to vector<8x8x8xf32>
    %26 = arith.subf %22, %25 : vector<8x8x8xf32>
    %27 = math.exp %26 : vector<8x8x8xf32>
    %cst_14 = arith.constant dense<0.000000e+00> : vector<8x8xf32>
    %28 = vector.multi_reduction <add>, %27, %cst_14 [2] : vector<8x8x8xf32> to vector<8x8xf32>
    %29 = vector.shape_cast %28 : vector<8x8xf32> to vector<8x8x1xf32>
    %30 = tpu.reciprocal %29 {approx = true} : vector<8x8x1xf32> -> vector<8x8x1xf32>
    %31 = vector.broadcast %30 : vector<8x8x1xf32> to vector<8x8x8xf32>
    %32 = arith.mulf %27, %31 : vector<8x8x8xf32>
    "tpu.trace_start"() <{level = 10 : i32, message = "gqk,gdk->gqd"}> : () -> ()
    %cst_15 = arith.constant dense<0.000000e+00> : vector<8x8x8xf32>
    %33 = tpu.matmul %32, %17, %cst_15 {dimension_numbers = #tpu.dot_dimension_numbers<[2], [2], [1], [1], [0, 0, 0, 1, 1, 1], [0], [0]>} : vector<8x8x8xf32>, vector<8x8x8xf32>, vector<8x8x8xf32> -> vector<8x8x8xf32>
    "tpu.trace_stop"() : () -> ()
    %34 = arith.addf %19, %33 : vector<8x8x8xf32>
    %35 = tpu.transpose %34, [0, 2, 1] : vector<8x8x8xf32> -> vector<8x8x8xf32>
    %36 = vector.shape_cast %35 : vector<8x8x8xf32> to vector<2x32x8xf32>
    %37 = tpu.transpose %36, [0, 2, 1] : vector<2x32x8xf32> -> vector<2x8x32xf32>
    %38 = vector.shape_cast %37 : vector<2x8x32xf32> to vector<16x32xf32>
    %c0_16 = arith.constant 0 : index
    %c0_17 = arith.constant 0 : index
    %39 = vector.load %arg6[%c0_16, %c0_17] : memref<32x32xf32, #tpu.memory_space<vmem>>, vector<32x32xf32>
    %cst_18 = arith.constant dense<0.000000e+00> : vector<16x32xf32>
    %40 = tpu.matmul %38, %39, %cst_18 {dimension_numbers = #tpu.dot_dimension_numbers<[1], [0], [0], [1], [0, 0, 1, 1], [], []>} : vector<16x32xf32>, vector<32x32xf32>, vector<16x32xf32> -> vector<16x32xf32>
    %c0_19 = arith.constant 0 : index
    %c0_20 = arith.constant 0 : index
    %41 = vector.load %arg7[%c0_19, %c0_20] : memref<1x32xf32, #tpu.memory_space<vmem>>, vector<1x32xf32>
    %42 = vector.broadcast %41 : vector<1x32xf32> to vector<16x32xf32>
    %43 = arith.addf %40, %42 : vector<16x32xf32>
    %cst_21 = arith.constant 0.000000e+00 : f32
    %44 = vector.broadcast %cst_21 : f32 to vector<16x32xf32>
    %45 = arith.maximumf %43, %44 : vector<16x32xf32>
    %46 = arith.addf %38, %45 : vector<16x32xf32>
    %c0_22 = arith.constant 0 : index
    %c0_23 = arith.constant 0 : index
    %47 = vector.load %arg8[%c0_22, %c0_23] : memref<16x32xf32, #tpu.memory_space<vmem>>, vector<16x32xf32>
    %cst_24 = arith.constant dense<0.000000e+00> : vector<16x32xf32>
    %48 = tpu.matmul %1, %47, %cst_24 {dimension_numbers = #tpu.dot_dimension_numbers<[1], [0], [0], [1], [0, 0, 1, 1], [], []>} : vector<16x16xf32>, vector<16x32xf32>, vector<16x32xf32> -> vector<16x32xf32>
    %c0_25 = arith.constant 0 : index
    %c0_26 = arith.constant 0 : index
    %49 = vector.load %arg9[%c0_25, %c0_26] : memref<1x32xf32, #tpu.memory_space<vmem>>, vector<1x32xf32>
    %50 = vector.broadcast %49 : vector<1x32xf32> to vector<16x32xf32>
    %51 = arith.addf %48, %50 : vector<16x32xf32>
    %c0_27 = arith.constant 0 : index
    %c0_28 = arith.constant 0 : index
    %52 = vector.load %arg10[%c0_27, %c0_28] : memref<32x64xf32, #tpu.memory_space<vmem>>, vector<32x64xf32>
    %cst_29 = arith.constant dense<0.000000e+00> : vector<16x64xf32>
    %53 = tpu.matmul %46, %52, %cst_29 {dimension_numbers = #tpu.dot_dimension_numbers<[1], [0], [0], [1], [0, 0, 1, 1], [], []>} : vector<16x32xf32>, vector<32x64xf32>, vector<16x64xf32> -> vector<16x64xf32>
    %c0_30 = arith.constant 0 : index
    %c0_31 = arith.constant 0 : index
    %54 = vector.load %arg11[%c0_30, %c0_31] : memref<1x64xf32, #tpu.memory_space<vmem>>, vector<1x64xf32>
    %55 = vector.broadcast %54 : vector<1x64xf32> to vector<16x64xf32>
    %56 = arith.addf %53, %55 : vector<16x64xf32>
    %57 = vector.shape_cast %56 : vector<16x64xf32> to vector<2x8x64xf32>
    %58 = tpu.transpose %57, [0, 2, 1] : vector<2x8x64xf32> -> vector<2x64x8xf32>
    %59 = vector.extract_strided_slice %58 {offsets = [0, 0, 0], sizes = [2, 32, 8], strides = [1, 1, 1]} : vector<2x64x8xf32> to vector<2x32x8xf32>
    %60 = vector.shape_cast %59 : vector<2x32x8xf32> to vector<8x8x8xf32>
    %61 = vector.extract_strided_slice %58 {offsets = [0, 32, 0], sizes = [2, 32, 8], strides = [1, 1, 1]} : vector<2x64x8xf32> to vector<2x32x8xf32>
    %62 = vector.shape_cast %61 : vector<2x32x8xf32> to vector<8x8x8xf32>
    %63 = vector.shape_cast %51 : vector<16x32xf32> to vector<2x8x32xf32>
    %64 = tpu.transpose %63, [0, 2, 1] : vector<2x8x32xf32> -> vector<2x32x8xf32>
    %65 = vector.shape_cast %64 : vector<2x32x8xf32> to vector<8x8x8xf32>
    %66 = tpu.transpose %65, [0, 2, 1] : vector<8x8x8xf32> -> vector<8x8x8xf32>
    "tpu.trace_start"() <{level = 10 : i32, message = "gqd,gdk->gqk"}> : () -> ()
    %cst_32 = arith.constant dense<0.000000e+00> : vector<8x8x8xf32>
    %67 = tpu.matmul %66, %60, %cst_32 {dimension_numbers = #tpu.dot_dimension_numbers<[2], [1], [1], [2], [0, 0, 0, 1, 1, 2], [0], [0]>} : vector<8x8x8xf32>, vector<8x8x8xf32>, vector<8x8x8xf32> -> vector<8x8x8xf32>
    "tpu.trace_stop"() : () -> ()
    %cst_33 = arith.constant dense<0xFF800000> : vector<8x8xf32>
    %68 = vector.multi_reduction <maximumf>, %67, %cst_33 [2] : vector<8x8x8xf32> to vector<8x8xf32>
    %69 = vector.shape_cast %68 : vector<8x8xf32> to vector<8x8x1xf32>
    %70 = vector.broadcast %69 : vector<8x8x1xf32> to vector<8x8x8xf32>
    %71 = arith.subf %67, %70 : vector<8x8x8xf32>
    %72 = math.exp %71 : vector<8x8x8xf32>
    %cst_34 = arith.constant dense<0.000000e+00> : vector<8x8xf32>
    %73 = vector.multi_reduction <add>, %72, %cst_34 [2] : vector<8x8x8xf32> to vector<8x8xf32>
    %74 = vector.shape_cast %73 : vector<8x8xf32> to vector<8x8x1xf32>
    %75 = tpu.reciprocal %74 {approx = true} : vector<8x8x1xf32> -> vector<8x8x1xf32>
    %76 = vector.broadcast %75 : vector<8x8x1xf32> to vector<8x8x8xf32>
    %77 = arith.mulf %72, %76 : vector<8x8x8xf32>
    "tpu.trace_start"() <{level = 10 : i32, message = "gqk,gdk->gqd"}> : () -> ()
    %cst_35 = arith.constant dense<0.000000e+00> : vector<8x8x8xf32>
    %78 = tpu.matmul %77, %62, %cst_35 {dimension_numbers = #tpu.dot_dimension_numbers<[2], [2], [1], [1], [0, 0, 0, 1, 1, 1], [0], [0]>} : vector<8x8x8xf32>, vector<8x8x8xf32>, vector<8x8x8xf32> -> vector<8x8x8xf32>
    "tpu.trace_stop"() : () -> ()
    %79 = arith.addf %66, %78 : vector<8x8x8xf32>
    %80 = tpu.transpose %79, [0, 2, 1] : vector<8x8x8xf32> -> vector<8x8x8xf32>
    %81 = vector.shape_cast %80 : vector<8x8x8xf32> to vector<2x32x8xf32>
    %82 = tpu.transpose %81, [0, 2, 1] : vector<2x32x8xf32> -> vector<2x8x32xf32>
    %83 = vector.shape_cast %82 : vector<2x8x32xf32> to vector<16x32xf32>
    %c0_36 = arith.constant 0 : index
    %c0_37 = arith.constant 0 : index
    %84 = vector.load %arg12[%c0_36, %c0_37] : memref<32x32xf32, #tpu.memory_space<vmem>>, vector<32x32xf32>
    %cst_38 = arith.constant dense<0.000000e+00> : vector<16x32xf32>
    %85 = tpu.matmul %83, %84, %cst_38 {dimension_numbers = #tpu.dot_dimension_numbers<[1], [0], [0], [1], [0, 0, 1, 1], [], []>} : vector<16x32xf32>, vector<32x32xf32>, vector<16x32xf32> -> vector<16x32xf32>
    %c0_39 = arith.constant 0 : index
    %c0_40 = arith.constant 0 : index
    %86 = vector.load %arg13[%c0_39, %c0_40] : memref<1x32xf32, #tpu.memory_space<vmem>>, vector<1x32xf32>
    %87 = vector.broadcast %86 : vector<1x32xf32> to vector<16x32xf32>
    %88 = arith.addf %85, %87 : vector<16x32xf32>
    %cst_41 = arith.constant 0.000000e+00 : f32
    %89 = vector.broadcast %cst_41 : f32 to vector<16x32xf32>
    %90 = arith.maximumf %88, %89 : vector<16x32xf32>
    %91 = arith.addf %83, %90 : vector<16x32xf32>
    %c0_42 = arith.constant 0 : index
    %c0_43 = arith.constant 0 : index
    %92 = vector.load %arg14[%c0_42, %c0_43] : memref<16x32xf32, #tpu.memory_space<vmem>>, vector<16x32xf32>
    tpu.vector_store %arg14[%c0_42, %c0_43], %91 {strides = array<i32>} : memref<16x32xf32, #tpu.memory_space<vmem>>, vector<16x32xf32>,
    return
  }
  func.func @transform_0(%arg0: i32) -> (i32, i32, i32) {
    %c0_i32 = arith.constant 0 : i32
    %c0_i32_0 = arith.constant 0 : i32
    %c0_i32_1 = arith.constant 0 : i32
    return %arg0, %c0_i32, %c0_i32_0 : i32, i32, i32
  }
  func.func @transform_1(%arg0: i32) -> (i32, i32, i32) {
    %c0_i32 = arith.constant 0 : i32
    %c0_i32_0 = arith.constant 0 : i32
    %c0_i32_1 = arith.constant 0 : i32
    return %arg0, %c0_i32, %c0_i32_0 : i32, i32, i32
  }
  func.func @transform_2(%arg0: i32) -> (i32, i32, i32) {
    %c0_i32 = arith.constant 0 : i32
    %c0_i32_0 = arith.constant 0 : i32
    %c0_i32_1 = arith.constant 0 : i32
    %c0_i32_2 = arith.constant 0 : i32
    return %c0_i32, %c0_i32_0, %c0_i32_1 : i32, i32, i32
  }
  func.func @transform_3(%arg0: i32) -> (i32, i32) {
    %c0_i32 = arith.constant 0 : i32
    %c0_i32_0 = arith.constant 0 : i32
    %c0_i32_1 = arith.constant 0 : i32
    return %c0_i32, %c0_i32_0 : i32, i32
  }
  func.func @transform_4(%arg0: i32) -> (i32, i32) {
    %c0_i32 = arith.constant 0 : i32
    %c0_i32_0 = arith.constant 0 : i32
    %c0_i32_1 = arith.constant 0 : i32
    return %c0_i32, %c0_i32_0 : i32, i32
  }
  func.func @transform_5(%arg0: i32) -> (i32, i32) {
    %c0_i32 = arith.constant 0 : i32
    %c0_i32_0 = arith.constant 0 : i32
    %c0_i32_1 = arith.constant 0 : i32
    return %c0_i32, %c0_i32_0 : i32, i32
  }
  func.func @transform_6(%arg0: i32) -> (i32, i32) {
    %c0_i32 = arith.constant 0 : i32
    %c0_i32_0 = arith.constant 0 : i32
    %c0_i32_1 = arith.constant 0 : i32
    return %c0_i32, %c0_i32_0 : i32, i32
  }
  func.func @transform_7(%arg0: i32) -> (i32, i32) {
    %c0_i32 = arith.constant 0 : i32
    %c0_i32_0 = arith.constant 0 : i32
    %c0_i32_1 = arith.constant 0 : i32
    return %c0_i32, %c0_i32_0 : i32, i32
  }
  func.func @transform_8(%arg0: i32) -> (i32, i32) {
    %c0_i32 = arith.constant 0 : i32
    %c0_i32_0 = arith.constant 0 : i32
    %c0_i32_1 = arith.constant 0 : i32
    return %c0_i32, %c0_i32_0 : i32, i32
  }
  func.func @transform_9(%arg0: i32) -> (i32, i32) {
    %c0_i32 = arith.constant 0 : i32
    %c0_i32_0 = arith.constant 0 : i32
    %c0_i32_1 = arith.constant 0 : i32
    return %c0_i32, %c0_i32_0 : i32, i32
  }
  func.func @transform_10(%arg0: i32) -> (i32, i32) {
    %c0_i32 = arith.constant 0 : i32
    %c0_i32_0 = arith.constant 0 : i32
    %c0_i32_1 = arith.constant 0 : i32
    return %c0_i32, %c0_i32_0 : i32, i32
  }
  func.func @transform_11(%arg0: i32) -> (i32, i32) {
    %c0_i32 = arith.constant 0 : i32
    %c0_i32_0 = arith.constant 0 : i32
    %c0_i32_1 = arith.constant 0 : i32
    return %c0_i32, %c0_i32_0 : i32, i32
  }
  func.func @transform_12(%arg0: i32) -> (i32, i32) {
    %c0_i32 = arith.constant 0 : i32
    %c0_i32_0 = arith.constant 0 : i32
    %c0_i32_1 = arith.constant 0 : i32
    return %c0_i32, %c0_i32_0 : i32, i32
  }
  func.func @transform_13(%arg0: i32) -> (i32, i32) {
    %c0_i32 = arith.constant 0 : i32
    %c0_i32_0 = arith.constant 0 : i32
    return %arg0, %c0_i32 : i32, i32
  }
}

</mosaic_0001>

<bundles_post_ra>
// kernel: tpu_custom_call.1
= control target key start
LH: loop header
LB: loop body
LE: loop exit
PB: predicated region body
PF: predicated region fallthrough
CT: control target
= control target key end

     0   :  { %s6607_s0 = inlined_call_operand.hbm [shape: f32[4,8,16], index: 0, kind: input, shape index: {}]   ;;  %s6608_s1 = inlined_call_operand.hbm [shape: f32[4,1,8], index: 1, kind: input, shape index: {}]   ;;  %s6609_s2 = inlined_call_operand.hbm [shape: f32[4,8,8], index: 2, kind: input, shape index: {}]   ;;  %s6610_s3 = inlined_call_operand.hbm [shape: f32[16,64], index: 3, kind: input, shape index: {}]   ;;  %s6611_s4 = inlined_call_operand.vmem [shape: f32[1,64], index: 4, kind: input, shape index: {}]   ;;  %s6612_s5 = inlined_call_operand.hbm [shape: f32[32,32], index: 5, kind: input, shape index: {}]   ;;  %s6613_s6 = inlined_call_operand.vmem [shape: f32[1,32], index: 6, kind: input, shape index: {}]   ;;  %s6614_s7 = inlined_call_operand.hbm [shape: f32[16,32], index: 7, kind: input, shape index: {}]   ;;  %s6615_s8 = inlined_call_operand.hbm [shape: f32[1,32], index: 8, kind: input, shape index: {}]   ;;  %s6616_s9 = inlined_call_operand.vmem [shape: f32[32,64], index: 9, kind: input, shape index: {}]   ;;  %s6617_s10 = inlined_call_operand.vmem [shape: f32[1,64], index: 10, kind: input, shape index: {}]   ;;  %s6618_s11 = inlined_call_operand.hbm [shape: f32[32,32], index: 11, kind: input, shape index: {}]   ;;  %s6619_s12 = inlined_call_operand.vmem [shape: f32[1,32], index: 12, kind: input, shape index: {}]   ;;  %s6620_s13 = inlined_call_operand.hbm [shape: f32[32,32], index: 13, kind: output, shape index: {}]  }
   0x1   :  { %6628 = sst [smem:[#allocation24_spill]] %s6607_s0 }
   0x2   :  { %6629 = sst [smem:[#allocation25_spill]] %s6609_s2 }
   0x3   :  { %6630 = sst [smem:[#allocation26_spill]] %s6610_s3 }
   0x4   :  { %6631 = sst [smem:[#allocation27_spill]] %s6612_s5 }
   0x5   :  { %6632 = sst [smem:[#allocation28_spill]] %s6613_s6 }
   0x6   :  { %6633 = sst [smem:[#allocation29_spill]] %s6614_s7 }
   0x7   :  { %6634 = sst [smem:[#allocation30_spill]] %s6615_s8 }
   0x8   :  { %6635 = sst [smem:[#allocation31_spill]] %s6616_s9 }
   0x9   :  { %6636 = sst [smem:[#allocation32_spill]] %s6617_s10 }
   0xa   :  { %6637 = sst [smem:[#allocation33_spill]] %s6619_s12 }
   0xb   :  { %6638 = sst [smem:[#allocation34_spill]] %s6620_s13 }
   0xc   :  { %18 = vsyncpa [#allocation3], 0 }
   0xd   :  { %20 = vsyncpa [#allocation3 + $0x1], 0 }
   0xe   :  { %21 = vsyncpa [#allocation6], 0 }
   0xf   :  { %23 = vsyncpa [#allocation6 + $0x1], 0 }
  0x10   :  { %24 = vsyncpa [#allocation9], 0 }
  0x11   :  { %25 = vsyncpa [#allocation12], 0 }
  0x12   :  { %26 = vsyncpa [#allocation15], 0 }
  0x13   :  { %27 = vsyncpa [#allocation4], 0 }
  0x14   :  { %29 = vsyncpa [#allocation4 + $0x1], 0  ;;  %s5903_s25 = smov 0   ;;  %s5905_s26 = smov 0  }
  0x15   :  { %s5907_s27 = smov 0   ;;  %s5909_s28 = smov 0  }
  0x16 LB: > { %s5816_s29 = smov [#allocation7]   ;;  %s5924_s14 = sadd.s32 4294967295, %s5814_s28   ;;  %s5814_s28 = sphi %s5909_s28, %s6677_s28   ;;  %s5810_s27 = sphi %s5907_s27, %s6676_s27   ;;  %s5806_s26 = sphi %s5905_s26, %s6675_s26   ;;  %s5802_s25 = sphi %s5903_s25, %s6674_s25  }
  0x17   : > { %s361_s30 = sshll.u32 %s5816_s29, 4  ;;  %p4890_p0 = scmp.ge.s32.totalorder %s5814_s28, 1  ;;  %s5929_s30 = int_to_ptr.vmem [resolvable:$true] %s361_s30 }
  0x18   : > { %p6623_p1 = scmp.eq.s32.totalorder %s5924_s14, 0  ;;  %p349_p2 = scmp.lt.s32.totalorder %s5814_s28, 3 }
  0x19   : > { %s5817_s16 = smov [#allocation8]   ;;  %s5818_s19 = smov [#allocation11]  }
  0x1a   : > { %p5931_p3 = pnand %p4890_p0, %p349_p2  ;;  %s374_s17 = sshll.u32 %s5817_s16, 4  ;;  %s5944_s17 = int_to_ptr.vmem [resolvable:$true] %s374_s17 }
  0x1b   : > { %s406_s20 = sshll.u32 %s5818_s19, 4  ;;  %s6641_s2 = sld [smem:[#allocation25_spill]]  ;;  %s5946_s20 = int_to_ptr.vmem [resolvable:$true] %s406_s20 }
  0x1c   : > { %s6639_s15 = scalar_select %p5931_p3, 1, 0 }
  0x1d   : > { %p5346_p5 = pneg %p5931_p3 }
  0x1f   : > { %p5940_p6 = pnand %p5346_p5, %p6623_p1 }
  0x21   : > { %s5500_s23 = scalar_lea.hbm %s6641_s2, 512  ;;  %p5956_p8 = pneg %p5940_p6 }
  0x22   : > { %p5501_p7 = scmp.ne.s32.totalorder %s6641_s2, %s5500_s23  ;;  %p5507_p11 = scmp.lt.u32.totalorder %s5500_s23, %s6641_s2 }
  0x24   : > { %p5503_p9 = pnand %p5956_p8, %p5501_p7 }
  0x26   : > { %p5504_p10 = pneg %p5503_p9 }
  0x28   : > { %p5509_p12 = pnand %p5507_p11, %p5504_p10 }
  0x2a   : > { %5512 = shalt.err (!%p5509_p12)
}
  0x2b   : > { %s5513_s21 = scalar_lea.vmem %s5929_s30, 512  ;;  %p5521_p5 = scmp.lt.s32.totalorder %s5929_s30, %s5929_s30 }
  0x2c   : > { %p5514_p13 = scmp.ne.s32.totalorder %s5929_s30, %s5513_s21  ;;  %p5522_p4 = scmp.lt.s32.totalorder %s5513_s21, %s5513_s21 }
  0x2e   : > { %p5516_p0 = pnand %p5514_p13, %p5956_p8  ;;  %p5523_p7 = por %p5522_p4, %p5521_p5 }
  0x30   : > { %p5517_p2 = pneg %p5516_p0 }
  0x32   : > { %p5524_p9 = pnand %p5523_p7, %p5517_p2 }
  0x34   : > { %5527 = shalt.err (!%p5524_p9)
}
  0x35   : > { %s6625_s22 = smov 128   ;;  %s6626_s13 = smov 8  }
  0x36   : > { %5349 = dma.hbm_to_vmem [thread:$0]  (!%p5940_p6), %s6641_s2, 512, %s5929_s30, [#allocation6], %s6625_s22, %s6625_s22, %s6626_s13  }
  0x37   : > { %s6643_s3 = sld [smem:[#allocation26_spill]] }
  0x3d   : > { %s5528_s21 = scalar_lea.hbm %s6643_s3, 256 }
  0x3e   : > { %p5529_p4 = scmp.ne.s32.totalorder %s6643_s3, %s5528_s21  ;;  %p5535_p12 = scmp.lt.u32.totalorder %s5528_s21, %s6643_s3 }
  0x40   : > { %p5531_p10 = pnand %p5529_p4, %p5956_p8 }
  0x42   : > { %p5532_p11 = pneg %p5531_p10 }
  0x44   : > { %p5537_p13 = pnand %p5535_p12, %p5532_p11 }
  0x46   : > { %5540 = shalt.err (!%p5537_p13)
}
  0x47   : > { %s5541_s30 = scalar_lea.vmem %s5944_s17, 256  ;;  %p5549_p7 = scmp.lt.s32.totalorder %s5944_s17, %s5944_s17 }
  0x48   : > { %p5542_p0 = scmp.ne.s32.totalorder %s5944_s17, %s5541_s30  ;;  %p5550_p9 = scmp.lt.s32.totalorder %s5541_s30, %s5541_s30 }
  0x4a   : > { %p5544_p2 = pnand %p5542_p0, %p5956_p8  ;;  %p5551_p4 = por %p5550_p9, %p5549_p7 }
  0x4c   : > { %p5545_p5 = pneg %p5544_p2 }
  0x4e   : > { %p5552_p10 = pnand %p5551_p4, %p5545_p5 }
  0x50   : > { %5555 = shalt.err (!%p5552_p10)
}
  0x51   : > { %5352 = dma.hbm_to_vmem [thread:$0]  (!%p5940_p6), %s6643_s3, 256, %s5944_s17, [#allocation9], %s6625_s22, %s6625_s22, %s6626_s13  }
  0x52   : > { %s6644_s7 = sld [smem:[#allocation29_spill]] }
  0x58   : > { %s5556_s23 = scalar_lea.hbm %s6644_s7, 256 }
  0x59   : > { %p5557_p11 = scmp.ne.s32.totalorder %s6644_s7, %s5556_s23  ;;  %p5563_p0 = scmp.lt.u32.totalorder %s5556_s23, %s6644_s7 }
  0x5b   : > { %p5559_p12 = pnand %p5557_p11, %p5956_p8 }
  0x5d   : > { %p5560_p13 = pneg %p5559_p12 }
  0x5f   : > { %p5565_p2 = pnand %p5563_p0, %p5560_p13 }
  0x61   : > { %5568 = shalt.err (!%p5565_p2)
}
  0x62   : > { %s5569_s17 = scalar_lea.vmem %s5946_s20, 256  ;;  %p5577_p4 = scmp.lt.s32.totalorder %s5946_s20, %s5946_s20 }
  0x63   : > { %p5570_p5 = scmp.ne.s32.totalorder %s5946_s20, %s5569_s17  ;;  %p5578_p10 = scmp.lt.s32.totalorder %s5569_s17, %s5569_s17 }
  0x65   : > { %p5572_p7 = pnand %p5570_p5, %p5956_p8  ;;  %p5579_p11 = por %p5578_p10, %p5577_p4 }
  0x67   : > { %p5573_p9 = pneg %p5572_p7 }
  0x69   : > { %p5580_p12 = pnand %p5579_p11, %p5573_p9 }
  0x6b   : > { %5583 = shalt.err (!%p5580_p12)
}
  0x6c   : > { %5358 = dma.hbm_to_vmem [thread:$0]  (!%p5940_p6), %s6644_s7, 256, %s5946_s20, [#allocation12], %s6625_s22, %s6625_s22, %s6626_s13  }
  0x6d   : > { %s5821_s9 = smov [#allocation10]   ;;  %s5822_s12 = smov [#allocation13]  }
  0x6e   : > { %s390_s10 = sshll.u32 %s5821_s9, 4  ;;  %s420_s23 = sshll.u32 %s5822_s12, 4  ;;  %s391_s10 = int_to_ptr.vmem [resolvable:$true] %s390_s10  ;;  %s421_s23 = int_to_ptr.vmem [resolvable:$true] %s420_s23 }
  0x6f   : > { %s6645_s5 = sld [smem:[#allocation27_spill]] }
  0x75   : > { %s5584_s19 = scalar_lea.hbm %s6645_s5, 512 }
  0x76   : > { %p5585_p13 = scmp.ne.s32.totalorder %s6645_s5, %s5584_s19  ;;  %p5591_p5 = scmp.lt.u32.totalorder %s5584_s19, %s6645_s5 }
  0x78   : > { %p5587_p0 = pnand %p5585_p13, %p5956_p8 }
  0x7a   : > { %p5588_p2 = pneg %p5587_p0 }
  0x7c   : > { %p5593_p7 = pnand %p5591_p5, %p5588_p2 }
  0x7e   : > { %5596 = shalt.err (!%p5593_p7)
}
  0x7f   : > { %s5597_s20 = scalar_lea.vmem %s391_s10, 512  ;;  %p5605_p11 = scmp.lt.s32.totalorder %s391_s10, %s391_s10 }
  0x80   : > { %p5598_p9 = scmp.ne.s32.totalorder %s391_s10, %s5597_s20  ;;  %p5606_p12 = scmp.lt.s32.totalorder %s5597_s20, %s5597_s20 }
  0x82   : > { %p5600_p4 = pnand %p5598_p9, %p5956_p8  ;;  %p5607_p1 = por %p5606_p12, %p5605_p11 }
  0x84   : > { %p5601_p10 = pneg %p5600_p4 }
  0x86   : > { %p5608_p3 = pnand %p5607_p1, %p5601_p10 }
  0x88   : > { %5611 = shalt.err (!%p5608_p3)
}
  0x89   : > { %5355 = dma.hbm_to_vmem [thread:$0]  (!%p5940_p6), %s6645_s5, 512, %s391_s10, [#allocation9], %s6625_s22, %s6625_s22, %s6626_s13  }
  0x8a   : > { %s6646_s8 = sld [smem:[#allocation30_spill]] }
  0x90   : > { %s5612_s24 = scalar_lea.hbm %s6646_s8, 16 }
  0x91   : > { %p5613_p1 = scmp.ne.s32.totalorder %s6646_s8, %s5612_s24  ;;  %p5619_p0 = scmp.lt.u32.totalorder %s5612_s24, %s6646_s8 }
  0x93   : > { %p5615_p3 = pnand %p5613_p1, %p5956_p8 }
  0x95   : > { %p5616_p13 = pneg %p5615_p3 }
  0x97   : > { %p5621_p2 = pnand %p5619_p0, %p5616_p13 }
  0x99   : > { %5624 = shalt.err (!%p5621_p2)
}
  0x9a   : > { %s5625_s30 = scalar_lea.vmem %s421_s23, 16  ;;  %s5632_s10 = scalar_lea.vmem %s421_s23, 32 }
  0x9b   : > { %p5626_p5 = scmp.ne.s32.totalorder %s421_s23, %s5625_s30  ;;  %p5633_p4 = scmp.lt.s32.totalorder %s421_s23, %s421_s23 }
  0x9c   : > { %p5634_p10 = scmp.lt.s32.totalorder %s5632_s10, %s5625_s30 }
  0x9d   : > { %p5628_p7 = pnand %p5626_p5, %p5956_p8 }
  0x9e   : > { %p5635_p11 = por %p5634_p10, %p5633_p4 }
  0x9f   : > { %p5629_p9 = pneg %p5628_p7 }
  0xa1   : > { %p5636_p12 = pnand %p5635_p11, %p5629_p9 }
  0xa3   : > { %5639 = shalt.err (!%p5636_p12)
}
  0xa4   : > { %5361 = dma.hbm_to_vmem [thread:$0]  (!%p5940_p6), %s6646_s8, 16, %s421_s23, [#allocation12]  }
  0xa5   : > { %s5823_s6 = smov [#allocation14]   ;;  %s5640_s29 = scalar_lea.hbm %s6618_s11, 512 }
  0xa6   : > { %s436_s9 = sshll.u32 %s5823_s6, 4  ;;  %p5641_p1 = scmp.ne.s32.totalorder %s6618_s11, %s5640_s29  ;;  %s437_s9 = int_to_ptr.vmem [resolvable:$true] %s436_s9 }
  0xa7   : > { %p5647_p0 = scmp.lt.u32.totalorder %s5640_s29, %s6618_s11 }
  0xa8   : > { %p5643_p3 = pnand %p5641_p1, %p5956_p8 }
  0xaa   : > { %p5644_p13 = pneg %p5643_p3 }
  0xac   : > { %p5649_p2 = pnand %p5647_p0, %p5644_p13 }
  0xae   : > { %5652 = shalt.err (!%p5649_p2)
}
  0xaf   : > { %s5653_s23 = scalar_lea.vmem %s437_s9, 512  ;;  %p5661_p4 = scmp.lt.s32.totalorder %s437_s9, %s437_s9 }
  0xb0   : > { %p5654_p5 = scmp.ne.s32.totalorder %s437_s9, %s5653_s23  ;;  %p5662_p10 = scmp.lt.s32.totalorder %s5653_s23, %s5653_s23 }
  0xb2   : > { %p5656_p7 = pnand %p5654_p5, %p5956_p8  ;;  %p5663_p11 = por %p5662_p10, %p5661_p4 }
  0xb4   : > { %p5657_p9 = pneg %p5656_p7 }
  0xb6   : > { %p5664_p12 = pnand %p5663_p11, %p5657_p9 }
  0xb8   : > { %5667 = shalt.err (!%p5664_p12)
}
  0xb9   : > { %5364 = dma.hbm_to_vmem [thread:$0]  (!%p5940_p6), %s6618_s11, 512, %s437_s9, [#allocation15], %s6625_s22, %s6625_s22, %s6626_s13  }
  0xba   : > { %s4889_s18 = sadd.s32 4294967294, %s5814_s28   ;;  %s6094_s16 = sadd.s32 1, %s5814_s28  }
  0xbb   : > { %s39_s2 = ssub.s32 %s5814_s28, %s6094_s16  ;;  %s42_s6 = sadd.s32 1, %s5810_s27 }
  0xbc   : > { %p40_p8 = scmp.eq.s32.totalorder %s39_s2, 0  ;;  %p49_p1 = scmp.ne.s32.totalorder %s5810_s27, %s5806_s26 }
  0xbd   : > { %p50_p3 = scmp.eq.s32.totalorder %s5814_s28, 0  ;;  %p55_p13 = scmp.ne.s32.totalorder %s5806_s26, %s5802_s25 }
  0xbe   : > { %s6105_s12 = scalar_select %p40_p8, %s5810_s27, %s42_s6  }
  0xbf   : > { %p6107_p0 = por %p50_p3, %p49_p1  ;;  %p6648_p2 = scmp.eq.s32.totalorder %s5924_s14, 0 }
  0xc0   : > { %p336_p5 = scmp.eq.s32.totalorder %s5924_s14, 1  ;;  %p342_p7 = scmp.eq.s32.totalorder %s4889_s18, 1 }
  0xc1   : > { %p6113_p6 = por %p6648_p2, %p55_p13  ;;  %p5382_p9 = scmp.lt.s32.totalorder %s5814_s28, 2 }
  0xc2   : > { %s6120_s29 = sand.u32 1, %s5810_s27   ;;  %p6122_p4 = por %p336_p5, %p49_p1 }
  0xc3   : > { %p6126_p10 = por %p342_p7, %p55_p13  ;;  %s4898_s17 = sshll.u32 %s6120_s29, 4 }
  0xc4   : > { %s6650_s19 = scalar_select %p6122_p4, 1, 0 }
  0xc5   : > { %s6651_s21 = scalar_select %p6126_p10, 1, 0 }
  0xc6   : > { %s4984_s30 = sshll.u32 %s5814_s28, 8  ;;  %s6652_s0 = sld [smem:[#allocation24_spill]] }
  0xc7   : > { %s457_s18 = scalar_lea.vmem [#allocation2], %s4898_s17  ;;  %p6141_p11 = pnand %p5382_p9, %p6107_p0 }
  0xc8   : > { %s464_s2 = sshll.u32 %s457_s18, 4  ;;  %s4901_s13 = sshll.u32 %s6120_s29, 1  ;;  %s6137_s2 = int_to_ptr.vmem [resolvable:$true] %s464_s2 }
  0xc9   : > { %s454_s23 = scalar_lea.sflag [#allocation3], %s6120_s29  ;;  %p5670_p8 = pneg %p6141_p11 }
  0xcc   : > { %s6135_s20 = scalar_lea.hbm %s6652_s0, %s4984_s30  ;;  %s5673_s24 = scalar_lea.hbm %s6652_s0, 512 }
  0xcd   : > { %s5668_s30 = scalar_lea.hbm %s6135_s20, 256  ;;  %p5674_p13 = scmp.lt.u32.totalorder %s6135_s20, %s6652_s0 }
  0xce   : > { %p5669_p12 = scmp.ne.s32.totalorder %s6135_s20, %s5668_s30  ;;  %p5675_p0 = scmp.lt.u32.totalorder %s5673_s24, %s5668_s30 }
  0xcf   : > { %p5677_p5 = scmp.lt.u32.totalorder %s5668_s30, %s6135_s20 }
  0xd0   : > { %p5671_p1 = pnand %p5670_p8, %p5669_p12  ;;  %p5676_p2 = por %p5675_p0, %p5674_p13 }
  0xd2   : > { %p5672_p3 = pneg %p5671_p1  ;;  %p5678_p7 = por %p5677_p5, %p5676_p2 }
  0xd4   : > { %p5679_p9 = pnand %p5678_p7, %p5672_p3 }
  0xd6   : > { %5682 = shalt.err (!%p5679_p9)
}
  0xd7   : > { %s5683_s22 = scalar_lea.vmem %s6137_s2, 256  ;;  %s5824_s17 = smov [#allocation2]  }
  0xd8   : > { %p5684_p12 = scmp.ne.s32.totalorder %s6137_s2, %s5683_s22  ;;  %s5688_s10 = sshll.u32 %s5824_s17, 4  ;;  %s5689_s10 = int_to_ptr.vmem [resolvable:$false] %s5688_s10 }
  0xd9   : > { %s5690_s3 = scalar_lea.vmem %s5689_s10, 512  ;;  %p5691_p4 = scmp.lt.s32.totalorder %s6137_s2, %s5689_s10 }
  0xda   : > { %p5686_p1 = pnand %p5684_p12, %p5670_p8  ;;  %p5692_p13 = scmp.lt.s32.totalorder %s5690_s3, %s5683_s22 }
  0xdc   : > { %p5687_p10 = pneg %p5686_p1  ;;  %p5693_p0 = por %p5692_p13, %p5691_p4 }
  0xde   : > { %p5694_p2 = pnand %p5693_p0, %p5687_p10 }
  0xe0   : > { %5697 = shalt.err (!%p5694_p2)
}
  0xe1   : > { %s6654_s30 = smov 8   ;;  %s6655_s24 = smov 128  }
  0xe2   : > { %5368 = dma.hbm_to_vmem [thread:$0]  (!%p6141_p11), %s6135_s20, 256, %s6137_s2, %s454_s23, %s6655_s24, %s6655_s24, %s6654_s30  }
  0xe3   : > { %s4985_s18 = sshll.u32 %s5814_s28, 5  ;;  %s478_s3 = scalar_lea.vmem [#allocation5], %s4901_s13 }
  0xe4   : > { %s6182_s10 = scalar_lea.hbm %s6608_s1, %s4985_s18  ;;  %s485_s0 = sshll.u32 %s478_s3, 4  ;;  %s6186_s0 = int_to_ptr.vmem [resolvable:$true] %s485_s0 }
  0xe5   : > { %s6656_s5 = sand.u32 1, %s5814_s28   ;;  %s5698_s8 = scalar_lea.hbm %s6182_s10, 32 }
  0xe6   : > { %s6190_s7 = scalar_lea.sflag [#allocation6], %s6656_s5  ;;  %p5699_p4 = scmp.ne.s32.totalorder %s6182_s10, %s5698_s8 }
  0xe7   : > { %s5703_s29 = scalar_lea.hbm %s6608_s1, 64  ;;  %p5704_p5 = scmp.lt.u32.totalorder %s6182_s10, %s6608_s1 }
  0xe8   : > { %p5701_p10 = pnand %p5699_p4, %p5670_p8  ;;  %p5705_p7 = scmp.lt.u32.totalorder %s5703_s29, %s5698_s8 }
  0xe9   : > { %p5707_p12 = scmp.lt.u32.totalorder %s5698_s8, %s6182_s10 }
  0xea   : > { %p5702_p3 = pneg %p5701_p10  ;;  %p5706_p9 = por %p5705_p7, %p5704_p5 }
  0xec   : > { %p5708_p1 = por %p5707_p12, %p5706_p9 }
  0xee   : > { %p5709_p13 = pnand %p5708_p1, %p5702_p3 }
  0xf0   : > { %5712 = shalt.err (!%p5709_p13)
}
  0xf1   : > { %s5713_s5 = scalar_lea.vmem %s6186_s0, 32  ;;  %s5825_s13 = smov [#allocation5]  }
  0xf2   : > { %p5714_p0 = scmp.ne.s32.totalorder %s6186_s0, %s5713_s5  ;;  %s5718_s24 = sshll.u32 %s5825_s13, 4  ;;  %s5719_s24 = int_to_ptr.vmem [resolvable:$false] %s5718_s24 }
  0xf3   : > { %s5720_s18 = scalar_lea.vmem %s5719_s24, 64  ;;  %p5721_p10 = scmp.lt.s32.totalorder %s6186_s0, %s5719_s24 }
  0xf4   : > { %p5716_p2 = pnand %p5714_p0, %p5670_p8  ;;  %p5722_p5 = scmp.lt.s32.totalorder %s5720_s18, %s5713_s5 }
  0xf6   : > { %p5717_p4 = pneg %p5716_p2  ;;  %p5723_p7 = por %p5722_p5, %p5721_p10 }
  0xf8   : > { %p5724_p9 = pnand %p5723_p7, %p5717_p4 }
  0xfa   : > { %5727 = shalt.err (!%p5724_p9)
}
  0xfb   : > { %s5826_s8 = smov 16   ;;  %s5827_s17 = smov 1  }
  0xfc   : > { %5371 = dma.hbm_to_vmem [thread:$0]  (!%p6141_p11), %s6182_s10, 32, %s6186_s0, %s6190_s7, %s5826_s8, %s5826_s8, %s5827_s17  }
  0xfd   : > { %p6657_p8 = scmp.ne.s32.totalorder %s6639_s15, 0 }
  0xfe   : > { %s6219_s22 = sand.u32 (!%p6657_p8), 1, %s5806_s26  }
  0xff   : > { %497 = sbr.rel (%p6657_p8) target bundleno = 3490 (0xda2), region = 72  ;;  %s4905_s3 = sshll.u32 (!%p6657_p8), %s6219_s22, 4 }
 0x100   : > { %s500_s20 = scalar_lea.sflag (!%p6657_p8), [#allocation3], %s6219_s22  ;;  %s503_s2 = scalar_lea.vmem (!%p6657_p8), [#allocation2], %s4905_s3 }
 0x106   : > { %5773 = dma.done.wait (%p6113_p6), %s500_s20, 256  }
 0x107   : > { %5775 = vsyncadd (%p6113_p6), %s500_s20, 4294967040  ;;  %s508_s0 = sand.u32 1, %s5924_s14   ;;  %s4906_s7 = sshll.u32 %s6219_s22, 1 }
 0x108   : > { %s509_s15 = scalar_lea.sflag [#allocation6], %s508_s0  ;;  %s6231_s6 = scalar_lea.vmem [#allocation5], %s4906_s7 }
 0x109   : > { %5777 = dma.done.wait (%p6113_p6), %s509_s15, 32  }
 0x10a   : > { %5779 = vsyncadd (%p6113_p6), %s509_s15, 4294967264  ;;  %p6658_p11 = scmp.eq.s32.totalorder %s5924_s14, 0 }
 0x10c   : > { %5781 = dma.done.wait (%p6658_p11), [#allocation6], 512   ;;  %p6659_p3 = pmov %p6658_p11 }
 0x10e   : > { %5783 = vsyncadd (%p6659_p3), [#allocation6], 4294966784  ;;  %p6660_p12 = pmov %p6659_p3 }
 0x10f   : > { %p6661_p1 = pmov %p6659_p3 }
 0x110   : > { %5785 = dma.done.wait (%p6660_p12), [#allocation9], 768  }
 0x111   : > { %5787 = vsyncadd (%p6661_p1), [#allocation9], 4294966528  ;;  %p6662_p13 = pmov %p6661_p1 }
 0x112   : > { %p6663_p0 = pmov %p6661_p1 }
 0x113   : > { %5789 = dma.done.wait (%p6662_p13), [#allocation12], 272  }
 0x114   : > { %5791 = vsyncadd (%p6663_p0), [#allocation12], 4294967024  ;;  %p6664_p6 = pmov %p6663_p0 }
 0x115   : > { %p6665_p2 = pmov %p6663_p0 }
 0x116   : > { %5793 = dma.done.wait (%p6664_p6), [#allocation15], 512  }
 0x117   : > { %5795 = vsyncadd (%p6665_p2), [#allocation15], 4294966784  ;;  %vm600_vm0 = vcmask 130048   ;;  %v591_v0 = vld [vmem:[#allocation8] sm:$0xff]  ;;  %v592_v1 = vld [vmem:[#allocation8 + $0x8] sm:$0xff]  ;;  %v5828_v5 = vmov 0.0  }
 0x118   : > { %v6253_v2 = vld [vmem:[%s503_s2] sm:$0xff]  ;;  %v5284_v3 = vpack.c.bf16 %v592_v1, %v591_v0  ;;  %v6257_v4 = vld [vmem:[%s503_s2 + $0x8] sm:$0xff]  ;;  %5089 = vmatprep.subr.mxu1 %v5828_v5  ;;  %vm5829_vm1 = vmmov 0   ;;  %vm762_vm2 = vcmask 64512   ;;  %vm2370_vm3 = vcmask 261120   ;;  %s6666_s30 = sld [smem:[#allocation31_spill]] }
 0x119   : > { %5081 = vmatprep.mubr.msk.f32.mxu0 %vm600_vm0, %v6253_v2  ;;  %v4914_v6 = vld [vmem:[%s6611_s4] ss:$0 sm:$0xff]  ;;  %5091 = vmatprep.mubr.msk.f32.mxu1 %vm5829_vm1, %v5828_v5  ;;  %v6270_v11 = vld [vmem:[#allocation7] sm:$0xff]  ;;  %v6275_v13 = vld [vmem:[#allocation7 + $0x8] sm:$0xff]  ;;  %s6667_s0 = sld [smem:[#allocation28_spill]]  ;;  %s6669_s29 = sld [smem:[#allocation33_spill]] }
 0x11a   : > { %5285 = vmatprep.subr.bf16.mxu0 %v5284_v3  ;;  %v6282_v15 = vld [vmem:[#allocation7 + $0x10] sm:$0xff]  ;;  %v6289_v17 = vld [vmem:[#allocation7 + $0x18] sm:$0xff]  ;;  %s4986_s23 = sshll.u32 %s5924_s14, 8  ;;  %s583_s5 = scalar_lea.vmem [#allocation16], %s4905_s3 }
 0x11b   : > { %5287 = vmatpush3.bf16.msra.mxu0 %v5284_v3  ;;  %v4917_v27 = vld [vmem:[%s6231_s6] ss:$0 sm:$0xff]  ;;  %v4918_v44 = vld [vmem:[%s6231_s6 + $0x1] ss:$0 sm:$0xff]  ;;  %s6668_s6 = sld [smem:[#allocation32_spill]]  ;;  %s4736_s13 = sshll.u32 %s583_s5, 4  ;;  %s6561_s13 = int_to_ptr.vmem [resolvable:$true] %s4736_s13 }
 0x11c   : > { %5084 = vmatprep.subr.mxu0 %v5828_v5  ;;  %s6670_s8 = sld [smem:[#allocation34_spill]]  ;;  %s4723_s14 = scalar_lea.sflag [#allocation4], %s6219_s22 }
 0x11d   : > { %s5728_s3 = scalar_lea.vmem %s6561_s13, 256  ;;  %p6671_p10 = scmp.ne.s32.totalorder %s6650_s19, 0 }
 0x11e   : > { %5082 = vmatmul.mubr.msk.f32.vlgmr.msra.gmra.mrb[0].mxu0 %vm600_vm0, %v6257_v4  ;;  %p5729_p4 = scmp.ne.s32.totalorder %s6561_s13, %s5728_s3  ;;  %s5830_s20 = smov [#allocation16]  }
 0x11f   : > { %5086 = vmatprep.mubr.msk.f32.mxu0 %vm5829_vm1, %v5828_v5  ;;  %s5732_s2 = sshll.u32 %s5830_s20, 4  ;;  %s5733_s2 = int_to_ptr.vmem [resolvable:$false] %s5732_s2 }
 0x120   : > { %p5730_p5 = pnand %p5729_p4, %p6671_p10  ;;  %p5735_p9 = scmp.lt.s32.totalorder %s6561_s13, %s5733_s2 }
 0x122   : > { %s6559_s17 = scalar_lea.hbm %s6670_s8, %s4986_s23  ;;  %p5731_p7 = pneg %p5730_p5 }
 0x1f1   : > { %v5083_v7 = vpop.f32.mrb[0].mxu0 }
 0x1f2   : > { %v673_v8 = vpop.f32.mrb[1].mxu0  ;;  %v679_v10 = vadd.f32 %v5083_v7, %v4914_v6 }
 0x1f3   : > { %v674_v9 = vadd.f32 %v4914_v6, %v673_v8 }
 0x1f5   : > { %682 = vxpose.xlu0.b32.start.end [1/1] (short) (narrow) %v674_v9, 64 }
 0x212   : > { %714 = vxpose.xlu0.b32.start.end [1/1] (short) (narrow) %v679_v10, 64 }
 0x275   : > { %v698_v12 = vpop.trf.xlu0 }
 0x276   : > { %5085 = vmatpush3.msra.mxu0 %v698_v12 }
 0x277   : > { %5087 = vmatmul.mubr.msk.f32.vlgmr.msra.gmra.mrb[2].mxu0 %vm762_vm2, %v6270_v11  ;;  %5094 = vmatprep.subr.mxu0 %v5828_v5 }
 0x278   : > { %5096 = vmatprep.mubr.msk.f32.mxu0 %vm5829_vm1, %v5828_v5 }
 0x279   : > { %v699_v14 = vpop.trf.xlu0 }
 0x27a   : > { %5090 = vmatpush3.msra.mxu1 %v699_v14 }
 0x27b   : > { %5092 = vmatmul.mubr.msk.f32.vlgmr.msra.gmra.mrb[0].mxu1 %vm762_vm2, %v6275_v13  ;;  %5099 = vmatprep.subr.mxu1 %v5828_v5 }
 0x27c   : > { %5101 = vmatprep.mubr.msk.f32.mxu1 %vm5829_vm1, %v5828_v5 }
 0x27d   : > { %v700_v16 = vpop.trf.xlu0 }
 0x27e   : > { %5095 = vmatpush3.msra.mxu0 %v700_v16 }
 0x27f   : > { %5097 = vmatmul.mubr.msk.f32.vlgmr.msra.gmra.mrb[4].mxu0 %vm762_vm2, %v6282_v15  ;;  %5104 = vmatprep.subr.mxu0 %v5828_v5 }
 0x280   : > { %5106 = vmatprep.mubr.msk.f32.mxu0 %vm5829_vm1, %v5828_v5 }
 0x281   : > { %v701_v18 = vpop.trf.xlu0 }
 0x282   : > { %5100 = vmatpush3.msra.mxu1 %v701_v18 }
 0x283   : > { %5102 = vmatmul.mubr.msk.f32.vlgmr.msra.gmra.mrb[2].mxu1 %vm762_vm2, %v6289_v17  ;;  %5109 = vmatprep.subr.mxu1 %v5828_v5 }
 0x284   : > { %5111 = vmatprep.mubr.msk.f32.mxu1 %vm5829_vm1, %v5828_v5 }
 0x285   : > { %v702_v19 = vpop.trf.xlu0 }
 0x289   : > { %v703_v20 = vpop.trf.xlu0 }
 0x28d   : > { %v6298_v21 = vpop.trf.xlu0 }
 0x291   : > { %v6300_v22 = vpop.trf.xlu0 }
 0x295   : > { %v730_v23 = vpop.trf.xlu0 }
 0x296   : > { %5105 = vmatpush3.msra.mxu0 %v730_v23 }
 0x297   : > { %5107 = vmatmul.mubr.msk.f32.vlgmr.msra.gmra.mrb[6].mxu0 %vm762_vm2, %v6270_v11  ;;  %5114 = vmatprep.subr.mxu0 %v5828_v5 }
 0x298   : > { %5116 = vmatprep.mubr.msk.f32.mxu0 %vm5829_vm1, %v5828_v5 }
 0x299   : > { %v731_v24 = vpop.trf.xlu0 }
 0x29a   : > { %5110 = vmatpush3.msra.mxu1 %v731_v24 }
 0x29b   : > { %5112 = vmatmul.mubr.msk.f32.vlgmr.msra.gmra.mrb[4].mxu1 %vm762_vm2, %v6275_v13  ;;  %5119 = vmatprep.subr.mxu1 %v5828_v5 }
 0x29c   : > { %5121 = vmatprep.mubr.msk.f32.mxu1 %vm5829_vm1, %v5828_v5 }
 0x29d   : > { %v732_v25 = vpop.trf.xlu0 }
 0x29e   : > { %5115 = vmatpush3.msra.mxu0 %v732_v25 }
 0x29f   : > { %5117 = vmatmul.mubr.msk.f32.vlgmr.msra.gmra.mrb[8].mxu0 %vm762_vm2, %v6282_v15  ;;  %5124 = vmatprep.subr.mxu0 %v5828_v5 }
 0x2a0   : > { %5126 = vmatprep.mubr.msk.f32.mxu0 %vm5829_vm1, %v5828_v5 }
 0x2a1   : > { %v733_v26 = vpop.trf.xlu0 }
 0x2a2   : > { %5120 = vmatpush3.msra.mxu1 %v733_v26 }
 0x2a3   : > { %5122 = vmatmul.mubr.msk.f32.vlgmr.msra.gmra.mrb[6].mxu1 %vm762_vm2, %v6289_v17  ;;  %5129 = vmatprep.subr.mxu1 %v5828_v5 }
 0x2a4   : > { %5131 = vmatprep.mubr.msk.f32.mxu1 %vm5829_vm1, %v5828_v5 }
 0x2a5   : > { %5125 = vmatpush3.xpose.msk.msra.mxu0 %vm762_vm2, %v702_v19 }
 0x2a6   : > { %5134 = vmatprep.subr.mxu0 %v5828_v5 }
 0x2a9   : > { %5130 = vmatpush3.xpose.msk.msra.mxu1 %vm762_vm2, %v703_v20 }
 0x2aa   : > { %5139 = vmatprep.subr.mxu1 %v5828_v5 }
 0x34a   : > { %v832_v28 = vpop.f32.mrb[2].mxu0 }
 0x34b   : > { %v833_v29 = vadd.f32 %v4917_v27, %v832_v28  ;;  %v5088_v30 = vpop.f32.mrb[3].mxu0 }
 0x34d   : > { %v1335_v31 = vsel %vm762_vm2, %v833_v29, -inf }
 0x34e   : > { %1336 = vmax.xlane.f32.xlu1 %v1335_v31  ;;  %v905_v32 = vpop.f32.mrb[0].mxu1 }
 0x34f   : > { %v906_v33 = vadd.f32 %v4917_v27, %v905_v32  ;;  %v5093_v34 = vpop.f32.mrb[1].mxu1 }
 0x351   : > { %v1338_v35 = vsel %vm762_vm2, %v906_v33, -inf }
 0x352   : > { %1339 = vmax.xlane.f32.xlu1 %v1338_v35  ;;  %v978_v36 = vpop.f32.mrb[4].mxu0 }
 0x353   : > { %v979_v37 = vadd.f32 %v4917_v27, %v978_v36  ;;  %v5098_v38 = vpop.f32.mrb[5].mxu0 }
 0x355   : > { %v1341_v39 = vsel %vm762_vm2, %v979_v37, -inf }
 0x356   : > { %1342 = vmax.xlane.f32.xlu1 %v1341_v39  ;;  %v1051_v40 = vpop.f32.mrb[2].mxu1 }
 0x357   : > { %v1052_v41 = vadd.f32 %v4917_v27, %v1051_v40  ;;  %v5103_v42 = vpop.f32.mrb[3].mxu1 }
 0x359   : > { %v1344_v43 = vsel %vm762_vm2, %v1052_v41, -inf }
 0x35a   : > { %1345 = vmax.xlane.f32.xlu1 %v1344_v43 }
 0x36a   : > { %v1121_v45 = vpop.f32.mrb[6].mxu0 }
 0x36b   : > { %v1122_v46 = vadd.f32 %v4918_v44, %v1121_v45  ;;  %v5108_v47 = vpop.f32.mrb[7].mxu0 }
 0x36d   : > { %v1347_v48 = vsel %vm762_vm2, %v1122_v46, -inf }
 0x36e   : > { %1348 = vmax.xlane.f32.xlu1 %v1347_v48  ;;  %v1191_v49 = vpop.f32.mrb[4].mxu1 }
 0x36f   : > { %v1192_v50 = vadd.f32 %v4918_v44, %v1191_v49  ;;  %v5113_v51 = vpop.f32.mrb[5].mxu1 }
 0x371   : > { %v1350_v52 = vsel %vm762_vm2, %v1192_v50, -inf }
 0x372   : > { %1351 = vmax.xlane.f32.xlu1 %v1350_v52  ;;  %v1261_v53 = vpop.f32.mrb[8].mxu0 }
 0x373   : > { %v1262_v54 = vadd.f32 %v4918_v44, %v1261_v53  ;;  %v5118_v55 = vpop.f32.mrb[9].mxu0 }
 0x375   : > { %v1353_v56 = vsel %vm762_vm2, %v1262_v54, -inf }
 0x376   : > { %1354 = vmax.xlane.f32.xlu1 %v1353_v56  ;;  %v1331_v57 = vpop.f32.mrb[6].mxu1 }
 0x377   : > { %v1332_v58 = vadd.f32 %v4918_v44, %v1331_v57  ;;  %v5123_v59 = vpop.f32.mrb[7].mxu1 }
 0x379   : > { %v1356_v60 = vsel %vm762_vm2, %v1332_v58, -inf }
 0x37a   : > { %1357 = vmax.xlane.f32.xlu1 %v1356_v60 }
 0x3db   : > { %v1337_v61 = vpop.xlane.xlu1 %1336 }
 0x3dc   : > { %v1359_v62 = vsub.f32 %v833_v29, %v1337_v61 }
 0x3de   : > { %v1367_v63 = vmul.f32 1.442695, %v1359_v62 }
 0x3df   : > { %v1340_v0 = vpop.xlane.xlu1 %1339 }
 0x3e0   : > { %5436 = vpow2.f32 %v1367_v63  ;;  %v1360_v1 = vsub.f32 %v906_v33, %v1340_v0 }
 0x3e2   : > { %v1369_v3 = vmul.f32 1.442695, %v1360_v1 }
 0x3e3   : > { %v1343_v6 = vpop.xlane.xlu1 %1342 }
 0x3e4   : > { %5438 = vpow2.f32 %v1369_v3  ;;  %v1361_v7 = vsub.f32 %v979_v37, %v1343_v6 }
 0x3e6   : > { %v1371_v8 = vmul.f32 1.442695, %v1361_v7 }
 0x3e7   : > { %v1346_v9 = vpop.xlane.xlu1 %1345 }
 0x3e8   : > { %5440 = vpow2.f32 %v1371_v8  ;;  %v1362_v10 = vsub.f32 %v1052_v41, %v1346_v9 }
 0x3ea   : > { %v5437_v12 = vpop.eup %5436  ;;  %v1373_v14 = vmul.f32 1.442695, %v1362_v10 }
 0x3eb   : > { %v1383_v16 = vsel %vm762_vm2, %v5437_v12, 0.0 }
 0x3ec   : > { %5442 = vpow2.f32 %v1373_v14  ;;  %1384 = vadd.xlane.f32.xlu1 %v1383_v16 }
 0x3ee   : > { %v5439_v18 = vpop.eup %5438 }
 0x3ef   : > { %v1386_v19 = vsel %vm762_vm2, %v5439_v18, 0.0 }
 0x3f0   : > { %1387 = vadd.xlane.f32.xlu0 %v1386_v19 }
 0x3f2   : > { %v5441_v20 = vpop.eup %5440 }
 0x3f3   : > { %v1389_v23 = vsel %vm762_vm2, %v5441_v20, 0.0 }
 0x3f4   : > { %1390 = vadd.xlane.f32.xlu1 %v1389_v23 }
 0x3f6   : > { %v5443_v24 = vpop.eup %5442 }
 0x3f7   : > { %v1392_v25 = vsel %vm762_vm2, %v5443_v24, 0.0 }
 0x3f8   : > { %1393 = vadd.xlane.f32.xlu1 %v1392_v25 }
 0x3fb   : > { %v1349_v26 = vpop.xlane.xlu1 %1348 }
 0x3fc   : > { %v1363_v27 = vsub.f32 %v1122_v46, %v1349_v26  ;;  %v734_v46 = vpop.trf.xlu0 }
 0x3fe   : > { %v1375_v28 = vmul.f32 1.442695, %v1363_v27 }
 0x3ff   : > { %v1352_v29 = vpop.xlane.xlu1 %1351 }
 0x400   : > { %5444 = vpow2.f32 %v1375_v28  ;;  %v1364_v30 = vsub.f32 %v1192_v50, %v1352_v29  ;;  %v735_v47 = vpop.trf.xlu0 }
 0x402   : > { %v1377_v31 = vmul.f32 1.442695, %v1364_v30 }
 0x403   : > { %v1355_v32 = vpop.xlane.xlu1 %1354 }
 0x404   : > { %5446 = vpow2.f32 %v1377_v31  ;;  %v1365_v33 = vsub.f32 %v1262_v54, %v1355_v32  ;;  %v736_v48 = vpop.trf.xlu0 }
 0x406   : > { %v1379_v34 = vmul.f32 1.442695, %v1365_v33 }
 0x407   : > { %v1358_v35 = vpop.xlane.xlu1 %1357 }
 0x408   : > { %5448 = vpow2.f32 %v1379_v34  ;;  %v1366_v36 = vsub.f32 %v1332_v58, %v1358_v35  ;;  %v737_v49 = vpop.trf.xlu0 }
 0x40a   : > { %v5445_v37 = vpop.eup %5444  ;;  %v1381_v38 = vmul.f32 1.442695, %v1366_v36 }
 0x40b   : > { %v1395_v39 = vsel %vm762_vm2, %v5445_v37, 0.0 }
 0x40c   : > { %5450 = vpow2.f32 %v1381_v38  ;;  %1396 = vadd.xlane.f32.xlu1 %v1395_v39 }
 0x40e   : > { %v5447_v40 = vpop.eup %5446 }
 0x40f   : > { %v1398_v41 = vsel %vm762_vm2, %v5447_v40, 0.0 }
 0x410   : > { %1399 = vadd.xlane.f32.xlu1 %v1398_v41  ;;  %v2360_v41 = vld [vmem:[#allocation10 + $0x8] sm:$0xff] }
 0x412   : > { %v5449_v42 = vpop.eup %5448 }
 0x413   : > { %v1401_v43 = vsel %vm762_vm2, %v5449_v42, 0.0 }
 0x414   : > { %1402 = vadd.xlane.f32.xlu1 %v1401_v43  ;;  %v2362_v43 = vld [vmem:[#allocation10 + $0x18] sm:$0xff] }
 0x416   : > { %v5451_v44 = vpop.eup %5450 }
 0x417   : > { %v1404_v45 = vsel %vm762_vm2, %v5451_v44, 0.0 }
 0x418   : > { %1405 = vadd.xlane.f32.xlu1 %v1404_v45 }
 0x479   : > { %v1385_v50 = vpop.xlane.xlu1 %1384 }
 0x47a   : > { %5452 = vrcp.f32 %v1385_v50 }
 0x47d   : > { %v1388_v51 = vpop.xlane.xlu0 %1387 }
 0x47e   : > { %5454 = vrcp.f32 %v1388_v51 }
 0x481   : > { %v1391_v52 = vpop.xlane.xlu1 %1390 }
 0x482   : > { %5456 = vrcp.f32 %v1391_v52 }
 0x484   : > { %v5453_v53 = vpop.eup %5452 }
 0x485   : > { %v1415_v54 = vmul.f32 %v5453_v53, %v5437_v12  ;;  %v1394_v55 = vpop.xlane.xlu1 %1393 }
 0x486   : > { %5458 = vrcp.f32 %v1394_v55  ;;  %v2540_v55 = vld [vmem:[%s6666_s30] sm:$0xff] }
 0x487   : > { %5127 = vmatmul.mubr.msk.f32.vlgmr.msra.gmra.mrb[10].mxu0 %vm762_vm2, %v1415_v54 }
 0x488   : > { %v5455_v56 = vpop.eup %5454  ;;  %5135 = vmatpush3.xpose.msk.msra.mxu0 %vm762_vm2, %v6298_v21  ;;  %5136 = vmatprep.mubr.msk.f32.mxu0 %vm5829_vm1, %v5828_v5 }
 0x489   : > { %v1416_v57 = vmul.f32 %v5455_v56, %v5439_v18  ;;  %5144 = vmatprep.subr.mxu0 %v5828_v5 }
 0x48b   : > { %5132 = vmatmul.mubr.msk.f32.vlgmr.msra.gmra.mrb[8].mxu1 %vm762_vm2, %v1416_v57  ;;  %v2542_v57 = vld [vmem:[%s6666_s30 + $0x10] sm:$0xff] }
 0x48c   : > { %v5457_v58 = vpop.eup %5456  ;;  %5140 = vmatpush3.xpose.msk.msra.mxu1 %vm762_vm2, %v6300_v22  ;;  %5141 = vmatprep.mubr.msk.f32.mxu1 %vm5829_vm1, %v5828_v5 }
 0x48d   : > { %v1417_v59 = vmul.f32 %v5457_v58, %v5441_v20  ;;  %5149 = vmatprep.subr.mxu1 %v5828_v5  ;;  %v2543_v58 = vld [vmem:[%s6666_s30 + $0x18] sm:$0xff] }
 0x48f   : > { %5137 = vmatmul.mubr.msk.f32.vlgmr.msra.gmra.mrb[12].mxu0 %vm762_vm2, %v1417_v59  ;;  %v5304_v59 = vpack.c.bf16 %v2543_v58, %v2542_v57 }
 0x490   : > { %v5459_v21 = vpop.eup %5458  ;;  %5145 = vmatpush3.xpose.msk.msra.mxu0 %vm762_vm2, %v734_v46  ;;  %5146 = vmatprep.mubr.msk.f32.mxu0 %vm5829_vm1, %v5828_v5 }
 0x491   : > { %v1418_v60 = vmul.f32 %v5459_v21, %v5443_v24  ;;  %5154 = vmatprep.subr.mxu0 %v5828_v5 }
 0x493   : > { %5142 = vmatmul.mubr.msk.f32.vlgmr.msra.gmra.mrb[10].mxu1 %vm762_vm2, %v1418_v60  ;;  %v4946_v60 = vld [vmem:[#allocation13] ss:$0 sm:$0xff] }
 0x494   : > { %5150 = vmatpush3.xpose.msk.msra.mxu1 %vm762_vm2, %v735_v47  ;;  %5151 = vmatprep.mubr.msk.f32.mxu1 %vm5829_vm1, %v5828_v5  ;;  %v2456_v47 = vld [vmem:[#allocation11] sm:$0xff] }
 0x495   : > { %5159 = vmatprep.subr.mxu1 %v5828_v5 }
 0x499   : > { %v1397_v22 = vpop.xlane.xlu1 %1396 }
 0x49a   : > { %5460 = vrcp.f32 %v1397_v22 }
 0x49d   : > { %v1400_v61 = vpop.xlane.xlu1 %1399 }
 0x49e   : > { %5462 = vrcp.f32 %v1400_v61 }
 0x4a1   : > { %v1403_v62 = vpop.xlane.xlu1 %1402 }
 0x4a2   : > { %5464 = vrcp.f32 %v1403_v62 }
 0x4a4   : > { %v5461_v63 = vpop.eup %5460 }
 0x4a5   : > { %v1419_v0 = vmul.f32 %v5461_v63, %v5445_v37  ;;  %v1406_v1 = vpop.xlane.xlu1 %1405  ;;  %v4943_v63 = vld [vmem:[%s6667_s0] ss:$0 sm:$0xff]  ;;  %s5734_s0 = scalar_lea.vmem %s5733_s2, 512 }
 0x4a6   : > { %5466 = vrcp.f32 %v1406_v1  ;;  %p5736_p8 = scmp.lt.s32.totalorder %s5734_s0, %s5728_s3 }
 0x4a7   : > { %5147 = vmatmul.mubr.msk.f32.vlgmr.msra.gmra.mrb[14].mxu0 %vm762_vm2, %v1419_v0 }
 0x4a8   : > { %v5463_v3 = vpop.eup %5462  ;;  %5155 = vmatpush3.xpose.msk.msra.mxu0 %vm762_vm2, %v736_v48  ;;  %5156 = vmatprep.mubr.msk.f32.mxu0 %vm5829_vm1, %v5828_v5  ;;  %v2457_v48 = vld [vmem:[#allocation11 + $0x8] sm:$0xff]  ;;  %p5737_p11 = por %p5736_p8, %p5735_p9 }
 0x4a9   : > { %v1420_v6 = vmul.f32 %v5463_v3, %v5447_v40  ;;  %v2359_v40 = vld [vmem:[#allocation10] sm:$0xff] }
 0x4aa   : > { %p5738_p3 = pnand %p5737_p11, %p5731_p7 }
 0x4ab   : > { %5152 = vmatmul.mubr.msk.f32.vlgmr.msra.gmra.mrb[12].mxu1 %vm762_vm2, %v1420_v6 }
 0x4ac   : > { %v5465_v7 = vpop.eup %5464  ;;  %5160 = vmatpush3.xpose.msk.msra.mxu1 %vm762_vm2, %v737_v49  ;;  %5161 = vmatprep.mubr.msk.f32.mxu1 %vm5829_vm1, %v5828_v5  ;;  %v5296_v49 = vpack.c.bf16 %v2457_v48, %v2456_v47 }
 0x4ad   : > { %v1421_v8 = vmul.f32 %v5465_v7, %v5449_v42  ;;  %v5288_v42 = vpack.c.bf16 %v2360_v41, %v2359_v40 }
 0x4ae   : > { %5297 = vmatprep.subr.bf16.mxu1 %v5296_v49 }
 0x4af   : > { %5157 = vmatmul.mubr.msk.f32.vlgmr.msra.gmra.mrb[16].mxu0 %vm762_vm2, %v1421_v8  ;;  %5289 = vmatprep.subr.bf16.mxu0 %v5288_v42 }
 0x4b0   : > { %v5467_v9 = vpop.eup %5466  ;;  %5291 = vmatpush3.bf16.msra.mxu0 %v5288_v42 }
 0x4b1   : > { %v1422_v10 = vmul.f32 %v5467_v9, %v5451_v44 }
 0x4b3   : > { %5162 = vmatmul.mubr.msk.f32.vlgmr.msra.gmra.mrb[14].mxu1 %vm762_vm2, %v1422_v10 }
 0x4b4   : > { %5179 = vmatprep.mubr.msk.f32.mxu1 %vm600_vm0, %v6253_v2  ;;  %5299 = vmatpush3.bf16.msra.mxu1 %v5296_v49 }
 0x4b7   : > { %5180 = vmatmul.mubr.msk.f32.vlgmr.msra.gmra.mrb[16].mxu1 %vm600_vm0, %v6257_v4  ;;  %v2541_v4 = vld [vmem:[%s6666_s30 + $0x8] sm:$0xff] }
 0x4b8   : > { %v5300_v56 = vpack.c.bf16 %v2541_v4, %v2540_v55 }
 0x4ba   : > { %5301 = vmatprep.subr.bf16.mxu1 %v5300_v56 }
 0x4bb   : > { %5303 = vmatpush3.bf16.msra.mxu1 %v5300_v56 }
 0x4bc   : > { %5305 = vmatprep.subr.bf16.mxu1 %v5304_v59 }
 0x4bf   : > { %5307 = vmatpush3.bf16.msra.mxu1 %v5304_v59 }
 0x4c0   : > { %5203 = vmatprep.subr.mxu1 %v5828_v5 }
 0x55a   : > { %v1495_v12 = vpop.f32.mrb[10].mxu0 }
 0x55b   : > { %v2031_v14 = vadd.f32 %v1495_v12, %v6270_v11  ;;  %v5128_v16 = vpop.f32.mrb[11].mxu0 }
 0x55d   : > { %2039 = vxpose.xlu1.b32.start.end [1/1] (short) (narrow) %v2031_v14, 8 }
 0x55e   : > { %v1571_v18 = vpop.f32.mrb[8].mxu1 }
 0x55f   : > { %v2032_v19 = vadd.f32 %v1571_v18, %v6275_v13  ;;  %v5133_v20 = vpop.f32.mrb[9].mxu1 }
 0x561   : > { %2071 = vxpose.xlu1.b32.start.end [1/1] (short) (narrow) %v2032_v19, 8 }
 0x562   : > { %v1647_v23 = vpop.f32.mrb[12].mxu0 }
 0x563   : > { %v2033_v24 = vadd.f32 %v1647_v23, %v6282_v15  ;;  %v5138_v25 = vpop.f32.mrb[13].mxu0 }
 0x565   : > { %2103 = vxpose.xlu1.b32.start.end [1/1] (short) (narrow) %v2033_v24, 8  ;;  %v4949_v24 = vld [vmem:[%s6668_s6] ss:$0 sm:$0xff] }
 0x566   : > { %v1723_v26 = vpop.f32.mrb[10].mxu1 }
 0x567   : > { %v2034_v27 = vadd.f32 %v1723_v26, %v6289_v17  ;;  %v5143_v28 = vpop.f32.mrb[11].mxu1 }
 0x569   : > { %2135 = vxpose.xlu1.b32.start.end [1/1] (short) (narrow) %v2034_v27, 8 }
 0x57a   : > { %v1799_v2 = vpop.f32.mrb[14].mxu0 }
 0x57b   : > { %v2035_v29 = vadd.f32 %v1799_v2, %v6270_v11  ;;  %v5148_v30 = vpop.f32.mrb[15].mxu0  ;;  %v2361_v11 = vld [vmem:[#allocation10 + $0x10] sm:$0xff] }
 0x57c   : > { %v5292_v44 = vpack.c.bf16 %v2362_v43, %v2361_v11 }
 0x57d   : > { %2167 = vxpose.xlu0.b32.start.end [1/1] (short) (narrow) %v2035_v29, 8 }
 0x57e   : > { %v1875_v31 = vpop.f32.mrb[12].mxu1  ;;  %5293 = vmatprep.subr.bf16.mxu0 %v5292_v44 }
 0x57f   : > { %v2036_v32 = vadd.f32 %v1875_v31, %v6275_v13  ;;  %v5153_v33 = vpop.f32.mrb[13].mxu1  ;;  %5295 = vmatpush3.bf16.msra.mxu0 %v5292_v44 }
 0x580   : > { %5193 = vmatprep.subr.mxu0 %v5828_v5 }
 0x581   : > { %2199 = vxpose.xlu1.b32.start.end [1/1] (short) (narrow) %v2036_v32, 8 }
 0x582   : > { %v1951_v34 = vpop.f32.mrb[16].mxu0 }
 0x583   : > { %v2037_v35 = vadd.f32 %v1951_v34, %v6282_v15  ;;  %v5158_v36 = vpop.f32.mrb[17].mxu0 }
 0x585   : > { %2231 = vxpose.xlu1.b32.start.end [1/1] (short) (narrow) %v2037_v35, 8 }
 0x586   : > { %v2027_v37 = vpop.f32.mrb[14].mxu1 }
 0x587   : > { %v2038_v38 = vadd.f32 %v2027_v37, %v6289_v17  ;;  %v5163_v39 = vpop.f32.mrb[15].mxu1 }
 0x589   : > { %2263 = vxpose.xlu1.b32.start.end [1/1] (short) (narrow) %v2038_v38, 8 }
 0x58a   : > { %v5181_v21 = vpop.f32.mrb[16].mxu1 }
 0x58b   : > { %v2531_v22 = vpop.f32.mrb[17].mxu1  ;;  %v2537_v62 = vadd.f32 %v5181_v21, %v4946_v60 }
 0x58c   : > { %v2532_v61 = vadd.f32 %v4946_v60, %v2531_v22 }
 0x5dd   : > { %v2055_v13 = vpop.trf.xlu1 }
 0x5de   : > { %2295 = vxpose.xlu1.b32.start [1/4] (short) (narrow) %v2055_v13, 8 }
 0x5e1   : > { %v2087_v15 = vpop.trf.xlu1 }
 0x5e2   : > { %2296 = vxpose.xlu1.b32.cont [2/4] (short) (narrow) %v2087_v15, 8 }
 0x5e5   : > { %v2119_v45 = vpop.trf.xlu1 }
 0x5e6   : > { %2297 = vxpose.xlu1.b32.cont [3/4] (short) (narrow) %v2119_v45, 8 }
 0x5e9   : > { %v2151_v17 = vpop.trf.xlu1 }
 0x5ea   : > { %2298 = vxpose.xlu1.b32.end [4/4] (short) (narrow) %v2151_v17, 8 }
 0x5ee   : > { %2696 = vxpose.xlu1.b32.start.end [1/1] (short) (narrow) %v2532_v61, 32 }
 0x5fb   : > { %2728 = vxpose.xlu1.b32.start.end [1/1] (short) (narrow) %v2537_v62, 32 }
 0x5fd   : > { %v2183_v46 = vpop.trf.xlu0 }
 0x5fe   : > { %2327 = vxpose.xlu0.b32.start [1/4] (short) (narrow) %v2183_v46, 8 }
 0x601   : > { %v2215_v50 = vpop.trf.xlu1 }
 0x602   : > { %2328 = vxpose.xlu0.b32.cont [2/4] (short) (narrow) %v2215_v50, 8 }
 0x605   : > { %v2247_v51 = vpop.trf.xlu1 }
 0x606   : > { %2329 = vxpose.xlu0.b32.cont [3/4] (short) (narrow) %v2247_v51, 8 }
 0x609   : > { %v2279_v52 = vpop.trf.xlu1 }
 0x60a   : > { %2330 = vxpose.xlu0.b32.end [4/4] (short) (narrow) %v2279_v52, 8 }
 0x65e   : > { %v2311_v53 = vpop.trf.xlu1 }
 0x65f   : > { %5172 = vmatprep.mubr.msk.f32.mxu0 %vm2370_vm3, %v2311_v53 }
 0x66e   : > { %v2712_v12 = vpop.trf.xlu1 }
 0x66f   : > { %2760 = vxpose.xlu1.b32.start.end [1/1] (short) (narrow) %v2712_v12, 8 }
 0x672   : > { %v2713_v14 = vpop.trf.xlu1 }
 0x673   : > { %2792 = vxpose.xlu0.b32.start.end [1/1] (short) (narrow) %v2713_v14, 8 }
 0x676   : > { %v2714_v16 = vpop.trf.xlu1 }
 0x677   : > { %2824 = vxpose.xlu1.b32.start.end [1/1] (short) (narrow) %v2714_v16, 8 }
 0x67a   : > { %v2715_v18 = vpop.trf.xlu1 }
 0x67b   : > { %2856 = vxpose.xlu1.b32.start.end [1/1] (short) (narrow) %v2715_v18, 8 }
 0x67e   : > { %v2343_v54 = vpop.trf.xlu0  ;;  %v2744_v19 = vpop.trf.xlu1 }
 0x67f   : > { %5173 = vmatmul.mubr.msk.f32.vlgmr.msra.gmra.mrb[18].mxu0 %vm2370_vm3, %v2343_v54 }
 0x680   : > { %5195 = vmatprep.mubr.msk.f32.mxu0 %vm5829_vm1, %v5828_v5 }
 0x682   : > { %v2745_v20 = vpop.trf.xlu1 }
 0x683   : > { %2920 = vxpose.xlu0.b32.start.end [1/1] (short) (narrow) %v2745_v20, 8 }
 0x686   : > { %v2746_v23 = vpop.trf.xlu1 }
 0x687   : > { %2952 = vxpose.xlu0.b32.start.end [1/1] (short) (narrow) %v2746_v23, 8 }
 0x68a   : > { %v2747_v2 = vpop.trf.xlu1 }
 0x6ef   : > { %v6416_v29 = vpop.trf.xlu1 }
 0x6f3   : > { %v6418_v30 = vpop.trf.xlu0 }
 0x6f7   : > { %v6420_v31 = vpop.trf.xlu1 }
 0x6fb   : > { %v6424_v33 = vpop.trf.xlu1 }
 0x703   : > { %v6422_v32 = vpop.trf.xlu0 }
 0x707   : > { %v6426_v34 = vpop.trf.xlu0 }
 0x752   : > { %v5174_v0 = vpop.f32.mrb[18].mxu0 }
 0x753   : > { %v2449_v1 = vadd.f32 %v5174_v0, %v4943_v63  ;;  %v2443_v3 = vpop.f32.mrb[19].mxu0 }
 0x754   : > { %v2444_v6 = vadd.f32 %v4943_v63, %v2443_v3 }
 0x755   : > { %v2453_v7 = vmax.f32 %v2449_v1, 0.0 }
 0x756   : > { %v2452_v8 = vmax.f32 %v2444_v6, 0.0 }
 0x757   : > { %v2455_v10 = vadd.f32 %v2453_v7, %v2343_v54 }
 0x758   : > { %v2454_v9 = vadd.f32 %v2452_v8, %v2311_v53 }
 0x75a   : > { %5190 = vmatprep.mubr.msk.f32.mxu1 %vm2370_vm3, %v2454_v9 }
 0x75b   : > { %5191 = vmatmul.mubr.msk.f32.vlgmr.msra.gmra.mrb[18].mxu1 %vm2370_vm3, %v2455_v10 }
 0x75c   : > { %5205 = vmatprep.mubr.msk.f32.mxu1 %vm5829_vm1, %v5828_v5 }
 0x82e   : > { %v5192_v25 = vpop.f32.mrb[18].mxu1 }
 0x82f   : > { %v2629_v26 = vadd.f32 %v5192_v25, %v4949_v24  ;;  %v2623_v27 = vpop.f32.mrb[19].mxu1 }
 0x830   : > { %v2624_v28 = vadd.f32 %v4949_v24, %v2623_v27 }
 0x831   : > { %2664 = vxpose.xlu1.b32.start.end [1/1] (short) (narrow) %v2629_v26, 64 }
 0x832   : > { %2632 = vxpose.xlu0.b32.start.end [1/1] (short) (narrow) %v2624_v28, 64 }
 0x84e   : > { %2888 = vxpose.xlu1.b32.start.end [1/1] (short) (narrow) %v2744_v19, 8 }
 0x84f   : > { %2984 = vxpose.xlu0.b32.start.end [1/1] (short) (narrow) %v2747_v2, 8 }
 0x8b1   : > { %v2680_v35 = vpop.trf.xlu1 }
 0x8b2   : > { %v2648_v36 = vpop.trf.xlu0 }
 0x8b3   : > { %5194 = vmatpush3.msra.mxu0 %v2648_v36 }
 0x8b4   : > { %5196 = vmatmul.mubr.msk.f32.vlgmr.msra.gmra.mrb[20].mxu0 %vm762_vm2, %v6416_v29  ;;  %5198 = vmatprep.subr.mxu0 %v5828_v5 }
 0x8b5   : > { %v2681_v37 = vpop.trf.xlu1  ;;  %5200 = vmatprep.mubr.msk.f32.mxu0 %vm5829_vm1, %v5828_v5 }
 0x8b6   : > { %v2649_v38 = vpop.trf.xlu0 }
 0x8b7   : > { %5199 = vmatpush3.msra.mxu0 %v2649_v38 }
 0x8b8   : > { %5201 = vmatmul.mubr.msk.f32.vlgmr.msra.gmra.mrb[22].mxu0 %vm762_vm2, %v6418_v30  ;;  %5208 = vmatprep.subr.mxu0 %v5828_v5 }
 0x8b9   : > { %v2682_v39 = vpop.trf.xlu1  ;;  %5210 = vmatprep.mubr.msk.f32.mxu0 %vm5829_vm1, %v5828_v5 }
 0x8ba   : > { %v2650_v40 = vpop.trf.xlu0 }
 0x8bb   : > { %5204 = vmatpush3.msra.mxu1 %v2650_v40 }
 0x8bc   : > { %5206 = vmatmul.mubr.msk.f32.vlgmr.msra.gmra.mrb[20].mxu1 %vm762_vm2, %v6420_v31  ;;  %5213 = vmatprep.subr.mxu1 %v5828_v5 }
 0x8bd   : > { %v2683_v41 = vpop.trf.xlu1  ;;  %5214 = vmatpush3.msra.mxu1 %v2680_v35  ;;  %5215 = vmatprep.mubr.msk.f32.mxu1 %vm5829_vm1, %v5828_v5 }
 0x8be   : > { %v2651_v11 = vpop.trf.xlu0  ;;  %5223 = vmatprep.subr.mxu1 %v5828_v5 }
 0x8bf   : > { %5209 = vmatpush3.msra.mxu0 %v2651_v11 }
 0x8c0   : > { %5211 = vmatmul.mubr.msk.f32.vlgmr.msra.gmra.mrb[24].mxu0 %vm762_vm2, %v6424_v33  ;;  %5218 = vmatprep.subr.mxu0 %v5828_v5 }
 0x8c1   : > { %v6447_v42 = vpop.trf.xlu1  ;;  %5219 = vmatpush3.msra.mxu0 %v2681_v37  ;;  %5220 = vmatprep.mubr.msk.f32.mxu0 %vm5829_vm1, %v5828_v5 }
 0x8c2   : > { %v2652_v43 = vpop.trf.xlu0  ;;  %5228 = vmatprep.subr.mxu0 %v5828_v5 }
 0x8c4   : > { %5221 = vmatmul.mubr.msk.f32.vlgmr.msra.gmra.mrb[26].mxu0 %vm762_vm2, %v6422_v32 }
 0x8c5   : > { %5229 = vmatpush3.msra.mxu0 %v2683_v41  ;;  %v6454_v44 = vpop.trf.xlu1  ;;  %5230 = vmatprep.mubr.msk.f32.mxu0 %vm5829_vm1, %v5828_v5 }
 0x8c6   : > { %v2653_v13 = vpop.trf.xlu0  ;;  %5238 = vmatprep.subr.mxu0 %v5828_v5 }
 0x8c9   : > { %v6459_v15 = vpop.trf.xlu1 }
 0x8ca   : > { %v6461_v45 = vpop.trf.xlu0 }
 0x8cd   : > { %v6463_v17 = vpop.trf.xlu1 }
 0x8ce   : > { %v6465_v46 = vpop.trf.xlu0 }
 0x8d1   : > { %v6467_v47 = vpop.trf.xlu1 }
 0x8d2   : > { %5216 = vmatmul.mubr.msk.f32.vlgmr.msra.gmra.mrb[22].mxu1 %vm762_vm2, %v6467_v47  ;;  %v6471_v48 = vpop.trf.xlu0 }
 0x8d3   : > { %5224 = vmatpush3.msra.mxu1 %v2682_v39  ;;  %5231 = vmatmul.mubr.msk.f32.vlgmr.msra.gmra.mrb[28].mxu0 %vm762_vm2, %v6471_v48 }
 0x8d4   : > { %5225 = vmatprep.mubr.msk.f32.mxu1 %vm5829_vm1, %v5828_v5  ;;  %5239 = vmatpush3.xpose.msk.msra.mxu0 %vm762_vm2, %v2653_v13 }
 0x8d5   : > { %5233 = vmatprep.subr.mxu1 %v5828_v5  ;;  %5240 = vmatprep.mubr.msk.f32.mxu0 %vm5829_vm1, %v5828_v5 }
 0x8d6   : > { %5226 = vmatmul.mubr.msk.f32.vlgmr.msra.gmra.mrb[24].mxu1 %vm762_vm2, %v6426_v34  ;;  %5248 = vmatprep.subr.mxu0 %v5828_v5 }
 0x8d7   : > { %5235 = vmatprep.mubr.msk.f32.mxu1 %vm5829_vm1, %v5828_v5 }
 0x8da   : > { %5234 = vmatpush3.xpose.msk.msra.mxu1 %vm762_vm2, %v2652_v43 }
 0x8db   : > { %5243 = vmatprep.subr.mxu1 %v5828_v5 }
 0x987   : > { %v3085_v49 = vpop.f32.mrb[20].mxu0 }
 0x988   : > { %v5197_v50 = vpop.f32.mrb[21].mxu0  ;;  %v3600_v51 = vsel %vm762_vm2, %v3085_v49, -inf }
 0x989   : > { %3601 = vmax.xlane.f32.xlu0 %v3600_v51 }
 0x98b   : > { %v3158_v52 = vpop.f32.mrb[22].mxu0 }
 0x98c   : > { %v5202_v53 = vpop.f32.mrb[23].mxu0  ;;  %v3603_v54 = vsel %vm762_vm2, %v3158_v52, -inf }
 0x98d   : > { %3604 = vmax.xlane.f32.xlu1 %v3603_v54 }
 0x98f   : > { %v3231_v55 = vpop.f32.mrb[20].mxu1 }
 0x990   : > { %v5207_v4 = vpop.f32.mrb[21].mxu1  ;;  %v3606_v56 = vsel %vm762_vm2, %v3231_v55, -inf }
 0x991   : > { %3607 = vmax.xlane.f32.xlu0 %v3606_v56 }
 0x993   : > { %v3304_v57 = vpop.f32.mrb[24].mxu0 }
 0x994   : > { %v5212_v58 = vpop.f32.mrb[25].mxu0  ;;  %v3609_v59 = vsel %vm762_vm2, %v3304_v57, -inf }
 0x995   : > { %3610 = vmax.xlane.f32.xlu0 %v3609_v59 }
 0x997   : > { %v3450_v21 = vpop.f32.mrb[26].mxu0 }
 0x998   : > { %v5222_v60 = vpop.f32.mrb[27].mxu0  ;;  %v3615_v22 = vsel %vm762_vm2, %v3450_v21, -inf }
 0x999   : > { %3616 = vmax.xlane.f32.xlu0 %v3615_v22 }
 0x9a5   : > { %v3377_v61 = vpop.f32.mrb[22].mxu1 }
 0x9a6   : > { %v3596_v62 = vpop.f32.mrb[28].mxu0  ;;  %v3612_v63 = vsel %vm762_vm2, %v3377_v61, -inf  ;;  %v5217_v0 = vpop.f32.mrb[23].mxu1 }
 0x9a7   : > { %3613 = vmax.xlane.f32.xlu1 %v3612_v63  ;;  %v3621_v1 = vsel %vm762_vm2, %v3596_v62, -inf  ;;  %v5232_v3 = vpop.f32.mrb[29].mxu0 }
 0x9a8   : > { %3622 = vmax.xlane.f32.xlu0 %v3621_v1 }
 0x9a9   : > { %v3523_v6 = vpop.f32.mrb[24].mxu1 }
 0x9aa   : > { %v5227_v7 = vpop.f32.mrb[25].mxu1  ;;  %v3618_v8 = vsel %vm762_vm2, %v3523_v6, -inf }
 0x9ab   : > { %3619 = vmax.xlane.f32.xlu1 %v3618_v8 }
 0xa16   : > { %v3602_v9 = vpop.xlane.xlu0 %3601 }
 0xa17   : > { %v3624_v10 = vsub.f32 %v3085_v49, %v3602_v9 }
 0xa19   : > { %v3632_v12 = vmul.f32 1.442695, %v3624_v10 }
 0xa1a   : > { %v3605_v14 = vpop.xlane.xlu1 %3604 }
 0xa1b   : > { %5468 = vpow2.f32 %v3632_v12  ;;  %v3625_v16 = vsub.f32 %v3158_v52, %v3605_v14 }
 0xa1d   : > { %v3634_v18 = vmul.f32 1.442695, %v3625_v16 }
 0xa1e   : > { %v3608_v19 = vpop.xlane.xlu0 %3607 }
 0xa1f   : > { %5470 = vpow2.f32 %v3634_v18  ;;  %v3626_v20 = vsub.f32 %v3231_v55, %v3608_v19 }
 0xa21   : > { %v3636_v23 = vmul.f32 1.442695, %v3626_v20 }
 0xa22   : > { %v3611_v24 = vpop.xlane.xlu0 %3610 }
 0xa23   : > { %5472 = vpow2.f32 %v3636_v23  ;;  %v3627_v25 = vsub.f32 %v3304_v57, %v3611_v24 }
 0xa25   : > { %v5469_v26 = vpop.eup %5468  ;;  %v3638_v27 = vmul.f32 1.442695, %v3627_v25 }
 0xa26   : > { %v3617_v28 = vpop.xlane.xlu0 %3616  ;;  %v3648_v2 = vsel %vm762_vm2, %v5469_v26, 0.0 }
 0xa27   : > { %5474 = vpow2.f32 %v3638_v27  ;;  %v3629_v35 = vsub.f32 %v3450_v21, %v3617_v28  ;;  %3649 = vadd.xlane.f32.xlu1 %v3648_v2 }
 0xa29   : > { %v5471_v36 = vpop.eup %5470  ;;  %v3642_v37 = vmul.f32 1.442695, %v3629_v35 }
 0xa2a   : > { %v3651_v38 = vsel %vm762_vm2, %v5471_v36, 0.0 }
 0xa2b   : > { %5476 = vpow2.f32 %v3642_v37  ;;  %3652 = vadd.xlane.f32.xlu0 %v3651_v38 }
 0xa2d   : > { %v5473_v39 = vpop.eup %5472 }
 0xa2e   : > { %v3654_v40 = vsel %vm762_vm2, %v5473_v39, 0.0 }
 0xa2f   : > { %3655 = vadd.xlane.f32.xlu1 %v3654_v40 }
 0xa31   : > { %v5475_v41 = vpop.eup %5474 }
 0xa32   : > { %v3657_v11 = vsel %vm762_vm2, %v5475_v41, 0.0 }
 0xa33   : > { %3658 = vadd.xlane.f32.xlu0 %v3657_v11 }
 0xa34   : > { %v3614_v43 = vpop.xlane.xlu1 %3613 }
 0xa35   : > { %v5477_v13 = vpop.eup %5476  ;;  %v3628_v49 = vsub.f32 %v3377_v61, %v3614_v43  ;;  %v3623_v50 = vpop.xlane.xlu0 %3622 }
 0xa36   : > { %v3631_v51 = vsub.f32 %v3596_v62, %v3623_v50  ;;  %v3663_v52 = vsel %vm762_vm2, %v5477_v13, 0.0 }
 0xa37   : > { %v3640_v53 = vmul.f32 1.442695, %v3628_v49  ;;  %3664 = vadd.xlane.f32.xlu0 %v3663_v52 }
 0xa38   : > { %v3646_v54 = vmul.f32 1.442695, %v3631_v51  ;;  %v3620_v55 = vpop.xlane.xlu1 %3619 }
 0xa39   : > { %5478 = vpow2.f32 %v3640_v53  ;;  %v3630_v4 = vsub.f32 %v3523_v6, %v3620_v55  ;;  %v4624_v53 = vld [vmem:[#allocation14] sm:$0xff] }
 0xa3a   : > { %5480 = vpow2.f32 %v3646_v54  ;;  %v4626_v54 = vld [vmem:[#allocation14 + $0x10] sm:$0xff] }
 0xa3b   : > { %v3644_v56 = vmul.f32 1.442695, %v3630_v4  ;;  %v4627_v4 = vld [vmem:[#allocation14 + $0x18] sm:$0xff] }
 0xa3d   : > { %5482 = vpow2.f32 %v3644_v56  ;;  %v5312_v56 = vpack.c.bf16 %v4627_v4, %v4626_v54 }
 0xa43   : > { %v5479_v57 = vpop.eup %5478 }
 0xa44   : > { %v5481_v58 = vpop.eup %5480  ;;  %v3660_v59 = vsel %vm762_vm2, %v5479_v57, 0.0 }
 0xa45   : > { %3661 = vadd.xlane.f32.xlu1 %v3660_v59  ;;  %v3669_v21 = vsel %vm762_vm2, %v5481_v58, 0.0 }
 0xa46   : > { %3670 = vadd.xlane.f32.xlu0 %v3669_v21 }
 0xa47   : > { %v5483_v60 = vpop.eup %5482 }
 0xa48   : > { %v3666_v22 = vsel %vm762_vm2, %v5483_v60, 0.0 }
 0xa49   : > { %3667 = vadd.xlane.f32.xlu1 %v3666_v22 }
 0xab4   : > { %v3650_v61 = vpop.xlane.xlu1 %3649 }
 0xab5   : > { %5484 = vrcp.f32 %v3650_v61  ;;  %v4976_v61 = vld [vmem:[%s6669_s29] ss:$0 sm:$0xff] }
 0xab8   : > { %v3653_v62 = vpop.xlane.xlu0 %3652 }
 0xab9   : > { %5486 = vrcp.f32 %v3653_v62 }
 0xabc   : > { %v3656_v63 = vpop.xlane.xlu1 %3655 }
 0xabd   : > { %5488 = vrcp.f32 %v3656_v63 }
 0xabf   : > { %v5485_v0 = vpop.eup %5484 }
 0xac0   : > { %v3680_v1 = vmul.f32 %v5485_v0, %v5469_v26  ;;  %v3659_v3 = vpop.xlane.xlu0 %3658 }
 0xac1   : > { %5490 = vrcp.f32 %v3659_v3 }
 0xac2   : > { %5236 = vmatmul.mubr.msk.f32.vlgmr.msra.gmra.mrb[26].mxu1 %vm762_vm2, %v3680_v1 }
 0xac3   : > { %v5487_v6 = vpop.eup %5486  ;;  %5244 = vmatpush3.xpose.msk.msra.mxu1 %vm762_vm2, %v6461_v45  ;;  %5245 = vmatprep.mubr.msk.f32.mxu1 %vm5829_vm1, %v5828_v5 }
 0xac4   : > { %v3681_v7 = vmul.f32 %v5487_v6, %v5471_v36  ;;  %v3665_v8 = vpop.xlane.xlu0 %3664  ;;  %5253 = vmatprep.subr.mxu1 %v5828_v5 }
 0xac5   : > { %5492 = vrcp.f32 %v3665_v8 }
 0xac6   : > { %5241 = vmatmul.mubr.msk.f32.vlgmr.msra.gmra.mrb[30].mxu0 %vm762_vm2, %v3681_v7 }
 0xac7   : > { %v5489_v9 = vpop.eup %5488  ;;  %5249 = vmatpush3.xpose.msk.msra.mxu0 %vm762_vm2, %v6465_v46  ;;  %5250 = vmatprep.mubr.msk.f32.mxu0 %vm5829_vm1, %v5828_v5 }
 0xac8   : > { %v3682_v10 = vmul.f32 %v5489_v9, %v5473_v39  ;;  %5258 = vmatprep.subr.mxu0 %v5828_v5 }
 0xaca   : > { %5246 = vmatmul.mubr.msk.f32.vlgmr.msra.gmra.mrb[28].mxu1 %vm762_vm2, %v3682_v10 }
 0xacb   : > { %v5491_v45 = vpop.eup %5490  ;;  %5254 = vmatpush3.xpose.msk.msra.mxu1 %vm762_vm2, %v6447_v42  ;;  %5255 = vmatprep.mubr.msk.f32.mxu1 %vm5829_vm1, %v5828_v5 }
 0xacc   : > { %v3683_v12 = vmul.f32 %v5491_v45, %v5475_v41  ;;  %5263 = vmatprep.subr.mxu1 %v5828_v5 }
 0xace   : > { %5251 = vmatmul.mubr.msk.f32.vlgmr.msra.gmra.mrb[32].mxu0 %vm762_vm2, %v3683_v12 }
 0xacf   : > { %v5493_v46 = vpop.eup %5492  ;;  %5259 = vmatpush3.xpose.msk.msra.mxu0 %vm762_vm2, %v6454_v44  ;;  %5260 = vmatprep.mubr.msk.f32.mxu0 %vm5829_vm1, %v5828_v5 }
 0xad0   : > { %v3685_v14 = vmul.f32 %v5493_v46, %v5477_v13  ;;  %5268 = vmatprep.subr.mxu0 %v5828_v5 }
 0xad2   : > { %v3662_v16 = vpop.xlane.xlu1 %3661  ;;  %5261 = vmatmul.mubr.msk.f32.vlgmr.msra.gmra.mrb[34].mxu0 %vm762_vm2, %v3685_v14 }
 0xad3   : > { %5494 = vrcp.f32 %v3662_v16  ;;  %5269 = vmatpush3.xpose.msk.msra.mxu0 %vm762_vm2, %v6463_v17  ;;  %v3671_v42 = vpop.xlane.xlu0 %3670  ;;  %5270 = vmatprep.mubr.msk.f32.mxu0 %vm5829_vm1, %v5828_v5 }
 0xad4   : > { %5496 = vrcp.f32 %v3671_v42 }
 0xad6   : > { %v3668_v18 = vpop.xlane.xlu1 %3667 }
 0xad7   : > { %5498 = vrcp.f32 %v3668_v18 }
 0xadd   : > { %v5495_v44 = vpop.eup %5494 }
 0xade   : > { %v5497_v19 = vpop.eup %5496  ;;  %v3684_v20 = vmul.f32 %v5495_v44, %v5479_v57 }
 0xadf   : > { %v3687_v23 = vmul.f32 %v5497_v19, %v5481_v58 }
 0xae0   : > { %5256 = vmatmul.mubr.msk.f32.vlgmr.msra.gmra.mrb[30].mxu1 %vm762_vm2, %v3684_v20 }
 0xae1   : > { %v5499_v24 = vpop.eup %5498  ;;  %5264 = vmatpush3.xpose.msk.msra.mxu1 %vm762_vm2, %v6459_v15  ;;  %5271 = vmatmul.mubr.msk.f32.vlgmr.msra.gmra.mrb[36].mxu0 %vm762_vm2, %v3687_v23 }
 0xae2   : > { %v3686_v17 = vmul.f32 %v5499_v24, %v5483_v60  ;;  %5265 = vmatprep.mubr.msk.f32.mxu1 %vm5829_vm1, %v5828_v5 }
 0xae4   : > { %5266 = vmatmul.mubr.msk.f32.vlgmr.msra.gmra.mrb[32].mxu1 %vm762_vm2, %v3686_v17 }
 0xb95   : > { %v3760_v25 = vpop.f32.mrb[26].mxu1 }
 0xb96   : > { %v4296_v26 = vadd.f32 %v3760_v25, %v6416_v29  ;;  %v5237_v27 = vpop.f32.mrb[27].mxu1 }
 0xb98   : > { %4304 = vxpose.xlu1.b32.start.end [1/1] (short) (narrow) %v4296_v26, 8 }
 0xb99   : > { %v3836_v28 = vpop.f32.mrb[30].mxu0 }
 0xb9a   : > { %v4297_v2 = vadd.f32 %v3836_v28, %v6418_v30  ;;  %v5242_v35 = vpop.f32.mrb[31].mxu0 }
 0xb9c   : > { %4336 = vxpose.xlu0.b32.start.end [1/1] (short) (narrow) %v4297_v2, 8 }
 0xb9d   : > { %v3912_v36 = vpop.f32.mrb[28].mxu1 }
 0xb9e   : > { %v5247_v15 = vpop.f32.mrb[29].mxu1  ;;  %v4298_v30 = vadd.f32 %v3912_v36, %v6420_v31 }
 0xba1   : > { %v3988_v37 = vpop.f32.mrb[32].mxu0 }
 0xba2   : > { %v5252_v38 = vpop.f32.mrb[33].mxu0  ;;  %v4299_v52 = vadd.f32 %v3988_v37, %v6424_v33 }
 0xba5   : > { %v4140_v39 = vpop.f32.mrb[34].mxu0 }
 0xba6   : > { %v4301_v40 = vadd.f32 %v4140_v39, %v6422_v32  ;;  %v5262_v5 = vpop.f32.mrb[35].mxu0 }
 0xba8   : > { %4464 = vxpose.xlu1.b32.start.end [1/1] (short) (narrow) %v4301_v40, 8 }
 0xbb3   : > { %v4064_v41 = vpop.f32.mrb[30].mxu1 }
 0xbb4   : > { %v4300_v11 = vadd.f32 %v4064_v41, %v6467_v47  ;;  %v5257_v29 = vpop.f32.mrb[31].mxu1  ;;  %v4292_v43 = vpop.f32.mrb[36].mxu0  ;;  %v4625_v47 = vld [vmem:[#allocation14 + $0x8] sm:$0xff] }
 0xbb5   : > { %v5272_v13 = vpop.f32.mrb[37].mxu0  ;;  %v4303_v32 = vadd.f32 %v4292_v43, %v6471_v48  ;;  %v5308_v55 = vpack.c.bf16 %v4625_v47, %v4624_v53 }
 0xbb6   : > { %4432 = vxpose.xlu0.b32.start.end [1/1] (short) (narrow) %v4300_v11, 8 }
 0xbb7   : > { %v4216_v49 = vpop.f32.mrb[32].mxu1  ;;  %5309 = vmatprep.subr.bf16.mxu1 %v5308_v55 }
 0xbb8   : > { %v4302_v50 = vadd.f32 %v4216_v49, %v6426_v34  ;;  %v5267_v51 = vpop.f32.mrb[33].mxu1  ;;  %5311 = vmatpush3.bf16.msra.mxu1 %v5308_v55 }
 0xbb9   : > { %5313 = vmatprep.subr.bf16.mxu1 %v5312_v56 }
 0xbba   : > { %4368 = vxpose.xlu0.b32.start.end [1/1] (short) (narrow) %v4298_v30, 8  ;;  %4496 = vxpose.xlu1.b32.start.end [1/1] (short) (narrow) %v4302_v50, 8 }
 0xbbc   : > { %5315 = vmatpush3.bf16.msra.mxu1 %v5312_v56 }
 0xbbe   : > { %4400 = vxpose.xlu0.b32.start.end [1/1] (short) (narrow) %v4299_v52, 8  ;;  %4528 = vxpose.xlu1.b32.start.end [1/1] (short) (narrow) %v4303_v32, 8 }
 0xc18   : > { %v4320_v31 = vpop.trf.xlu1 }
 0xc19   : > { %4560 = vxpose.xlu0.b32.start [1/4] (short) (narrow) %v4320_v31, 8 }
 0xc1c   : > { %v4352_v34 = vpop.trf.xlu0 }
 0xc1d   : > { %4561 = vxpose.xlu0.b32.cont [2/4] (short) (narrow) %v4352_v34, 8 }
 0xc28   : > { %v4480_v57 = vpop.trf.xlu1 }
 0xc36   : > { %v4448_v33 = vpop.trf.xlu0 }
 0xc37   : > { %4592 = vxpose.xlu1.b32.start [1/4] (short) (narrow) %v4448_v33, 8 }
 0xc3a   : > { %v4384_v48 = vpop.trf.xlu0  ;;  %v4512_v58 = vpop.trf.xlu1 }
 0xc3b   : > { %4593 = vxpose.xlu1.b32.cont [2/4] (short) (narrow) %v4480_v57, 8  ;;  %4562 = vxpose.xlu0.b32.cont [3/4] (short) (narrow) %v4384_v48, 8 }
 0xc3e   : > { %v4416_v59 = vpop.trf.xlu0  ;;  %v4544_v21 = vpop.trf.xlu1 }
 0xc3f   : > { %4594 = vxpose.xlu1.b32.cont [3/4] (short) (narrow) %v4512_v58, 8  ;;  %4563 = vxpose.xlu0.b32.end [4/4] (short) (narrow) %v4416_v59, 8 }
 0xc43   : > { %4595 = vxpose.xlu1.b32.end [4/4] (short) (narrow) %v4544_v21, 8 }
 0xcb3   : > { %v4576_v60 = vpop.trf.xlu0 }
 0xcb4   : > { %5281 = vmatprep.mubr.msk.f32.mxu1 %vm2370_vm3, %v4576_v60 }
 0xcb7   : > { %v4608_v22 = vpop.trf.xlu1 }
 0xcb8   : > { %5282 = vmatmul.mubr.msk.f32.vlgmr.msra.gmra.mrb[34].mxu1 %vm2370_vm3, %v4608_v22 }
 0xd8b   : > { %v5283_v62 = vpop.f32.mrb[34].mxu1 }
 0xd8c   : > { %v4713_v63 = vadd.f32 %v5283_v62, %v4976_v61  ;;  %v4707_v0 = vpop.f32.mrb[35].mxu1 }
 0xd8d   : > { %v4708_v1 = vadd.f32 %v4976_v61, %v4707_v0 }
 0xd8e   : > { %v4717_v3 = vmax.f32 %v4713_v63, 0.0 }
 0xd8f   : > { %v4716_v6 = vmax.f32 %v4708_v1, 0.0 }
 0xd90   : > { %v4719_v7 = vadd.f32 %v4717_v3, %v4608_v22 }
 0xd91   : > { %v4718_v8 = vadd.f32 %v4716_v6, %v4576_v60 }
 0xd92   : > { %4721 = vst.msk [vmem:[%s583_s5 + $0x8] sm:$0xff] %vm2370_vm3, %v4719_v7 }
 0xd93   : > { %4720 = vst.msk [vmem:[%s583_s5] sm:$0xff] %vm2370_vm3, %v4718_v8 }
 0xd94   : > { %5741 = shalt.err (!%p5738_p3)
}
 0xd95   : > { %s5742_s7 = scalar_lea.hbm %s6559_s17, 256  ;;  %s5746_s9 = scalar_lea.hbm %s6670_s8, 512 }
 0xd96   : > { %p5743_p12 = scmp.ne.s32.totalorder %s6559_s17, %s5742_s7  ;;  %p5747_p0 = scmp.lt.u32.totalorder %s6559_s17, %s6670_s8 }
 0xd97   : > { %p5748_p6 = scmp.lt.u32.totalorder %s5746_s9, %s5742_s7  ;;  %p5750_p4 = scmp.lt.u32.totalorder %s5742_s7, %s6559_s17 }
 0xd98   : > { %p5744_p1 = pnand %p5743_p12, %p6671_p10 }
 0xd99   : > { %p5749_p2 = por %p5748_p6, %p5747_p0 }
 0xd9a   : > { %p5745_p13 = pneg %p5744_p1 }
 0xd9b   : > { %p5751_p5 = por %p5750_p4, %p5749_p2 }
 0xd9d   : > { %p5752_p7 = pnand %p5751_p5, %p5745_p13 }
 0xd9f   : > { %5755 = shalt.err (!%p5752_p7)
}
 0xda0   : > { %s5831_s23 = smov 128   ;;  %s5832_s5 = smov 8  }
 0xda1   : > { %5344 = dma.vmem_to_hbm [thread:$0]  (%p6671_p10), %s6561_s13, 256, %s6559_s17, %s4723_s14, %s5831_s23, %s5831_s23, %s5832_s5  }
 0xda2 PF: > { %s4751_s24 = sand.u32 1, %s5802_s25   ;;  %p6672_p9 = scmp.ne.s32.totalorder %s6651_s21, 0 }
 0xda3   : > { %p6673_p8 = scmp.ge.s32.totalorder %s5814_s28, 2  ;;  %s4752_s18 = scalar_lea.sflag [#allocation4], %s4751_s24 }
 0xda5   : > { %p5373_p11 = pnand %p6673_p8, %p6672_p9 }
 0xda7   : > { %5797 = dma.done.wait (!%p5373_p11), %s4752_s18, 256  }
 0xda8   : > { %5799 = vsyncadd (!%p5373_p11), %s4752_s18, 4294967040  ;;  %p32_p3 = scmp.ge.s32.totalorder %s6094_s16, 4   ;;  %s6674_s25 = smov %s5806_s26 }
 0xda9   : > { %s6675_s26 = smov %s5810_s27  ;;  %s6676_s27 = smov %s6105_s12 }
 0xdaa   : > { %s6677_s28 = smov %s6094_s16  ;;  %34 = sbr.rel (!%p32_p3) target bundleno = 22 (0x16), region = 154 }
 0xdb1   :  { %4757 = vsyncpa [#allocation3], 1 }
 0xdb2   :  { %4759 = vsyncpa [#allocation3 + $0x1], 1 }
 0xdb3   :  { %4760 = vsyncpa [#allocation6], 1 }
 0xdb4   :  { %4762 = vsyncpa [#allocation6 + $0x1], 1 }
 0xdb5   :  { %4763 = vsyncpa [#allocation9], 1 }
 0xdb6   :  { %4764 = vsyncpa [#allocation12], 1 }
 0xdb7   :  { %4765 = vsyncpa [#allocation15], 1 }
 0xdb8   :  { %4766 = vsyncpa [#allocation4], 1 }
 0xdb9   :  { %4768 = vsyncpa [#allocation4 + $0x1], 1 }

</bundles_post_ra>
